<compile_context>
chip_gen: v5e
topology: v5e:2x2
jax: 0.10.0
libtpu: 0.0.40
codegen_flags: <defaults>
</compile_context>

<pallas_src>
import jax
import jax.numpy as jnp
from jax import lax
from jax.experimental import pallas as pl
from jax.experimental.pallas import tpu as pltpu


def _round_up(v, m):
    return (v + m - 1) // m * m


def _tpu_generation():
    """Best-effort TPU generation from device_kind (plain Python, wrapper-side)."""
    try:
        kind = jax.devices()[0].device_kind.lower()
    except Exception:
        return 6
    if "v7" in kind or "7x" in kind:
        return 7
    if "v6" in kind:
        return 6
    if "v5" in kind:
        return 5
    if "v4" in kind:
        return 4
    return 6


def _pick_time_chunk(T, max_chunk):
    """Largest divisor of T that is <= max_chunk.

    Padding T is NOT semantics-preserving for an LSTM (gate biases move the state
    even for zero inputs), so only exact divisors are used; a prime T degenerates
    to Tc=1, which is correct but takes more grid steps."""
    for c in range(max(1, min(T, max_chunk)), 0, -1):
        if T % c == 0:
            return c
    return 1


def _tile_bytes(rows, cols, itemsize):
    """VMEM footprint of a (rows, cols) tile including sublane/lane padding."""
    sub = {4: 8, 2: 16, 1: 32}[itemsize]
    return _round_up(max(rows, 1), sub) * _round_up(max(cols, 1), 128) * itemsize


# --------------------------------------------------------------------------- #
# Kernel 1: LSTM recurrence (final hidden state only).
# --------------------------------------------------------------------------- #
def _lstm_kernel(x_ref,      # (Tc*TB, I)    bf16  pre-flattened chunk (time-major rows)
                 w_ih_ref,   # (I, 4*Hp)     bf16  W_ih^T, gate-major, per-gate padded
                 w_hh_ref,   # (Hp, 4*Hp)    bf16  W_hh^T, padded
                 b_ref,      # (1, 4*Hp)     f32   b_ih + b_hh, padded
                 h_out_ref,  # (TB, Hp)      f32   final hidden state
                 h_ref,      # (TB, Hp)      f32   scratch: hidden state (carried over t)
                 c_ref,      # (TB, Hp)      f32   scratch: cell state   (carried over t)
                 proj_ref):  # (Tc*TB, 4*Hp) f32   scratch: hoisted input projection
    t_chunk = pl.program_id(1)
    Hp = w_hh_ref.shape[0]
    TB = h_ref.shape[0]
    Tc = x_ref.shape[0] // TB

    # Initialize the recurrent state at the first time chunk of each batch tile.
    @pl.when(t_chunk == 0)
    def _init():
        h_ref[...] = jnp.zeros_like(h_ref)
        c_ref[...] = jnp.zeros_like(c_ref)

    # Hoisted input projection: one large bf16 MXU matmul per chunk; the bias
    # broadcast also happens once per chunk instead of once per timestep.
    proj_ref[...] = (jnp.dot(x_ref[...], w_ih_ref[...],
                             preferred_element_type=jnp.float32)
                     + b_ref[...])

    def lstm_step(t, carry):
        h, c = carry
        h_bf = h.astype(jnp.bfloat16)
        row0 = pl.multiple_of(t * TB, 8)

        # Per-gate (TB, Hp) computation: read the proj slice and the W_hh slice
        # straight from the refs and apply the nonlinearity immediately, so only
        # one (TB, Hp) f32 tile is live at a time (no (TB, 4*Hp) spill pressure).
        def gate(g):
            return (proj_ref[pl.ds(row0, TB), pl.ds(g * Hp, Hp)]
                    + jnp.dot(h_bf, w_hh_ref[:, pl.ds(g * Hp, Hp)],
                              preferred_element_type=jnp.float32))

        # PyTorch fused gate order: [i, f, g, o]. Elementwise math stays f32
        # (required on v5e; avoids bf16 error compounding in c over long T).
        i_g = jax.nn.sigmoid(gate(0))
        f_g = jax.nn.sigmoid(gate(1))
        c_new = f_g * c + i_g * jnp.tanh(gate(2))
        h_new = jax.nn.sigmoid(gate(3)) * jnp.tanh(c_new)
        return h_new, c_new

    h, c = lax.fori_loop(0, Tc, lstm_step, (h_ref[...], c_ref[...]), unroll=True)
    h_ref[...] = h
    c_ref[...] = c

    # Only the last chunk's hidden state is the module output of the LSTM stage.
    @pl.when(t_chunk == pl.num_programs(1) - 1)
    def _store():
        h_out_ref[...] = h


# --------------------------------------------------------------------------- #
# Kernel 2: chaos + fc1(relu) + fc2 head on the final hidden state.
# --------------------------------------------------------------------------- #
def _head_kernel(h_ref,      # (TB, Hp)   f32
                 chaos_ref,  # (Hp, Hp)   bf16
                 w1_ref,     # (Hp, H2p)  bf16
                 b1_ref,     # (1, H2p)   f32
                 w2_ref,     # (H2p, Op)  bf16
                 b2_ref,     # (1, Op)    f32
                 out_ref):   # (TB, Op)   f32
    chaos = jnp.tanh(jnp.dot(h_ref[...].astype(jnp.bfloat16), chaos_ref[...],
                             preferred_element_type=jnp.float32))
    hid = jnp.maximum(
        jnp.dot(chaos.astype(jnp.bfloat16), w1_ref[...],
                preferred_element_type=jnp.float32) + b1_ref[...],
        0.0)
    # Lane-dense (>=128) output store; the wrapper slices back to O.
    out_ref[...] = (jnp.dot(hid.astype(jnp.bfloat16), w2_ref[...],
                            preferred_element_type=jnp.float32)
                    + b2_ref[...])


def chaos_hybrid_net(x_bti, params):
    """x_bti: (B, T, I) float32, batch_first like the PyTorch module."""
    B, T, I = x_bti.shape
    H = params["w_hh_t"].shape[0]
    H2 = params["w1_t"].shape[1]
    O = params["w2_t"].shape[1]

    LANE = 128
    Hp = _round_up(H, LANE)        # padded hidden size (lane-aligned gate slices)
    H2p = _round_up(H2, LANE)      # padded fc1 width
    Op = _round_up(O, LANE)        # padded output width (lane-dense store)

    gen = _tpu_generation()
    vmem_ceiling = (48 if gen >= 7 else 100) * 2**20
    proj_budget = (10 if gen >= 7 else 28) * 2**20

    # Batch tiling: sublane-aligned; cap at 64 rows on v7x (when there is enough
    # batch) so the "parallel" batch axis spans both TensorCores, else 128.
    Bp = _round_up(B, 8)
    tb_cap = 64 if (gen >= 7 and Bp >= 16) else 128
    TB = min(Bp, tb_cap)
    Bp = _round_up(Bp, TB)
    nB = Bp // TB

    # Time chunk: bounded by the projection-scratch budget and by unroll size.
    max_tc = max(1, min(16, proj_budget // (TB * 4 * Hp * 4)))
    Tc = _pick_time_chunk(T, max_tc)
    nT = T // Tc

    f32, bf16 = jnp.float32, jnp.bfloat16

    # ---- Pad / cast parameters into the kernel layout. Padded weight rows/cols
    # and bias entries are zero, so padded hidden/cell lanes stay exactly zero
    # through the recurrence and the head.
    def pad2(a, r, c, dtype):
        return jnp.zeros((r, c), dtype).at[:a.shape[0], :a.shape[1]].set(a.astype(dtype))

    w_ih = params["w_ih_t"].reshape(I, 4, H)
    w_ih = (jnp.zeros((I, 4, Hp), bf16).at[:, :, :H].set(w_ih.astype(bf16))
            .reshape(I, 4 * Hp))
    w_hh = params["w_hh_t"].reshape(H, 4, H)
    w_hh = (jnp.zeros((Hp, 4, Hp), bf16).at[:H, :, :H].set(w_hh.astype(bf16))
            .reshape(Hp, 4 * Hp))
    b = params["b"].reshape(1, 4, H)
    b = jnp.zeros((1, 4, Hp), f32).at[:, :, :H].set(b).reshape(1, 4 * Hp)

    chaos = pad2(params["chaos"], Hp, Hp, bf16)
    w1 = pad2(params["w1_t"], Hp, H2p, bf16)
    b1 = pad2(params["b1"], 1, H2p, f32)
    w2 = pad2(params["w2_t"], H2p, Op, bf16)
    b2 = pad2(params["b2"], 1, Op, f32)

    # ---- x: (B,T,I) -> (nB, nT, Tc*TB, I) bf16, pre-flattened so the kernel gets a
    # 2-D block directly (no in-kernel reshape/relayout), rows ordered t-major then
    # batch within each (bi, ti) block. bf16 halves the streamed HBM traffic.
    x_p = jnp.zeros((Bp, T, I), f32).at[:B].set(x_bti.astype(f32))
    x_blk = (x_p.reshape(nB, TB, nT, Tc, I)
             .transpose(0, 2, 3, 1, 4)
             .reshape(nB, nT, Tc * TB, I)
             .astype(bf16))

    const2 = lambda bi, ti: (0, 0)
    lstm_in_specs = [
        pl.BlockSpec((None, None, Tc * TB, I), lambda bi, ti: (bi, ti, 0, 0)),  # x
        pl.BlockSpec((I, 4 * Hp), const2),                                      # w_ih
        pl.BlockSpec((Hp, 4 * Hp), const2),                                     # w_hh
        pl.BlockSpec((1, 4 * Hp), const2),                                      # b
    ]
    lstm_out_spec = pl.BlockSpec((TB, Hp), lambda bi, ti: (bi, 0))

    lstm_scratch = [
        pltpu.VMEM((TB, Hp), f32),             # h
        pltpu.VMEM((TB, Hp), f32),             # c
        pltpu.VMEM((Tc * TB, 4 * Hp), f32),    # hoisted input projection
    ]

    # VMEM budget from lane/sublane-padded resident footprints (+25% headroom,
    # per-generation ceiling). Streamed/blocked operands counted double-buffered.
    est = (2 * _tile_bytes(Tc * TB, I, 2)          # x (streamed, double-buffered)
           + 2 * _tile_bytes(TB, Hp, 4)            # h_out
           + 2 * _tile_bytes(I, 4 * Hp, 2)         # w_ih
           + 2 * _tile_bytes(Hp, 4 * Hp, 2)        # w_hh
           + 2 * _tile_bytes(1, 4 * Hp, 4)         # b
           + 2 * _tile_bytes(TB, Hp, 4)            # h, c scratch
           + _tile_bytes(Tc * TB, 4 * Hp, 4))      # proj scratch
    vmem_limit = int(min(vmem_ceiling, max(16 * 2**20, int(est * 1.25))))

    h_last = pl.pallas_call(
        _lstm_kernel,
        out_shape=jax.ShapeDtypeStruct((Bp, Hp), f32),
        grid_spec=pltpu.PrefetchScalarGridSpec(
            num_scalar_prefetch=0,
            grid=(nB, nT),
            in_specs=lstm_in_specs,
            out_specs=lstm_out_spec,
            scratch_shapes=lstm_scratch),
        compiler_params=pltpu.CompilerParams(
            dimension_semantics=("parallel", "arbitrary"),
            vmem_limit_bytes=vmem_limit),
    )(x_blk, w_ih, w_hh, b)

    # ---- Head: chaos + MLP in a separate tiny call so its weights are not
    # resident in VMEM during the recurrence.
    const_h = lambda bi: (0, 0)
    out_padded = pl.pallas_call(
        _head_kernel,
        out_shape=jax.ShapeDtypeStruct((Bp, Op), f32),
        grid_spec=pltpu.PrefetchScalarGridSpec(
            num_scalar_prefetch=0,
            grid=(nB,),
            in_specs=[
                pl.BlockSpec((TB, Hp), lambda bi: (bi, 0)),   # h_last
                pl.BlockSpec((Hp, Hp), const_h),              # chaos
                pl.BlockSpec((Hp, H2p), const_h),             # w1
                pl.BlockSpec((1, H2p), const_h),              # b1
                pl.BlockSpec((H2p, Op), const_h),             # w2
                pl.BlockSpec((1, Op), const_h),               # b2
            ],
            out_specs=pl.BlockSpec((TB, Op), lambda bi: (bi, 0))),
        compiler_params=pltpu.CompilerParams(
            dimension_semantics=("parallel",)),
    )(h_last, chaos, w1, b1, w2, b2)

    return out_padded[:B, :O]


def init_params(key, input_size, hidden_size, output_size):
    """Deterministic synthetic parameters matching the PyTorch shapes."""
    H, I, O = hidden_size, input_size, output_size
    ks = jax.random.split(key, 9)
    s_lstm = 1.0 / jnp.sqrt(H)
    s_fc1 = 1.0 / jnp.sqrt(H)
    s_fc2 = 1.0 / jnp.sqrt(H // 2)
    u = lambda k, shape, s: jax.random.uniform(k, shape, jnp.float32, -s, s)
    return {
        # LSTM: W_ih (4H, I), W_hh (4H, H) -> passed transposed (gate order [i,f,g,o])
        "w_ih_t": u(ks[0], (I, 4 * H), s_lstm),
        "w_hh_t": u(ks[1], (H, 4 * H), s_lstm),
        "b":      u(ks[2], (1, 4 * H), s_lstm) + u(ks[3], (1, 4 * H), s_lstm),  # b_ih + b_hh
        # chaos_weight = randn(H, H) * 0.1
        "chaos":  jax.random.normal(ks[4], (H, H), jnp.float32) * 0.1,
        # fc1: (H//2, H) -> transposed; fc2: (O, H//2) -> transposed
        "w1_t":   u(ks[5], (H, H // 2), s_fc1),
        "b1":     u(ks[6], (1, H // 2), s_fc1),
        "w2_t":   u(ks[7], (H // 2, O), s_fc2),
        "b2":     u(ks[8], (1, O), s_fc2),
    }


def reference_forward(x_bti, params):
    """Pure-JAX f32 reference of the PyTorch forward (for a tolerance check)."""
    B, T, _ = x_bti.shape
    H = params["w_hh_t"].shape[0]
    h = jnp.zeros((B, H), jnp.float32)
    c = jnp.zeros((B, H), jnp.float32)
    for t in range(T):
        gates = (x_bti[:, t, :] @ params["w_ih_t"] + h @ params["w_hh_t"]
                 + params["b"])
        i_g = jax.nn.sigmoid(gates[:, 0:H])
        f_g = jax.nn.sigmoid(gates[:, H:2 * H])
        g_g = jnp.tanh(gates[:, 2 * H:3 * H])
        o_g = jax.nn.sigmoid(gates[:, 3 * H:4 * H])
        c = f_g * c + i_g * g_g
        h = o_g * jnp.tanh(c)
    chaos = jnp.tanh(h @ params["chaos"])
    hid = jnp.maximum(chaos @ params["w1_t"] + params["b1"], 0.0)
    return hid @ params["w2_t"] + params["b2"]


if __name__ == "__main__":
    input_size, hidden_size, output_size = 16, 32, 8
    batch, seq = 2, 8

    key = jax.random.PRNGKey(0)
    k_x, k_p = jax.random.split(key)
    x = jax.random.normal(k_x, (batch, seq, input_size), jnp.float32)
    params = init_params(k_p, input_size, hidden_size, output_size)

    y = chaos_hybrid_net(x, params)
    jax.block_until_ready(y)
    assert y.shape == (batch, output_size)
    assert bool(jnp.all(jnp.isfinite(y)))

    # bf16 MXU operands with f32 accumulation -> loose tolerance vs. f32 reference.
    y_ref = reference_forward(x, params)
    max_err = float(jnp.max(jnp.abs(y - y_ref)))
    assert max_err < 5e-2, f"max abs error {max_err}"

    print("KERNEL_OK")
</pallas_src>

<mosaic_0001>
module attributes {stable_mosaic.version = 11 : i64} {
  func.func @_lstm_kernel(%arg0: i32, %arg1: i32, %arg2: memref<1x1x64x16xbf16, #tpu.memory_space<vmem>>, %arg3: memref<16x512xbf16, #tpu.memory_space<vmem>>, %arg4: memref<128x512xbf16, #tpu.memory_space<vmem>>, %arg5: memref<1x512xf32, #tpu.memory_space<vmem>>, %arg6: memref<8x128xf32, #tpu.memory_space<vmem>>, %arg7: memref<8x128xf32, #tpu.memory_space<vmem>>, %arg8: memref<8x128xf32, #tpu.memory_space<vmem>>, %arg9: memref<64x512xf32, #tpu.memory_space<vmem>>) attributes {dimension_semantics = [#tpu.dimension_semantics<parallel>, #tpu.dimension_semantics<arbitrary>], iteration_bounds = array<i64: 1, 1>, scalar_prefetch = 0 : i64, scratch_operands = 3 : i64, tpu.core_type = #tpu.core_type<tc>, window_params = [{transform_indices = @transform_0, window_bounds = array<i64: 1, 1, 64, 16>}, {pipeline_mode = #tpu.pipeline_mode<synchronous>, transform_indices = @transform_1, window_bounds = array<i64: 16, 512>}, {pipeline_mode = #tpu.pipeline_mode<synchronous>, transform_indices = @transform_2, window_bounds = array<i64: 128, 512>}, {pipeline_mode = #tpu.pipeline_mode<synchronous>, transform_indices = @transform_3, window_bounds = array<i64: 1, 512>}, {transform_indices = @transform_4, window_bounds = array<i64: 8, 128>}]} {
    %c0_i32 = arith.constant 0 : i32
    %0 = arith.cmpi eq, %arg1, %c0_i32 : i32
    %1 = arith.extui %0 : i1 to i32
    %c0_i32_0 = arith.constant 0 : i32
    %2 = arith.cmpi ne, %1, %c0_i32_0 : i32
    scf.if %2 {
      %cst_178 = arith.constant 0.000000e+00 : f32
      %370 = vector.broadcast %cst_178 : f32 to vector<8x128xf32>
      %c0_179 = arith.constant 0 : index
      %c0_180 = arith.constant 0 : index
      %371 = vector.load %arg7[%c0_179, %c0_180] : memref<8x128xf32, #tpu.memory_space<vmem>>, vector<8x128xf32>
      tpu.vector_store %arg7[%c0_179, %c0_180], %370 {strides = array<i32>} : memref<8x128xf32, #tpu.memory_space<vmem>>, vector<8x128xf32>,
      %cst_181 = arith.constant 0.000000e+00 : f32
      %372 = vector.broadcast %cst_181 : f32 to vector<8x128xf32>
      %c0_182 = arith.constant 0 : index
      %c0_183 = arith.constant 0 : index
      %373 = vector.load %arg8[%c0_182, %c0_183] : memref<8x128xf32, #tpu.memory_space<vmem>>, vector<8x128xf32>
      tpu.vector_store %arg8[%c0_182, %c0_183], %372 {strides = array<i32>} : memref<8x128xf32, #tpu.memory_space<vmem>>, vector<8x128xf32>,
    } else {
    }
    %c0 = arith.constant 0 : index
    %c0_1 = arith.constant 0 : index
    %c0_2 = arith.constant 0 : index
    %c0_3 = arith.constant 0 : index
    %3 = vector.load %arg2[%c0, %c0_1, %c0_2, %c0_3] : memref<1x1x64x16xbf16, #tpu.memory_space<vmem>>, vector<1x1x64x16xbf16>
    %4 = vector.shape_cast %3 : vector<1x1x64x16xbf16> to vector<64x16xbf16>
    %c0_4 = arith.constant 0 : index
    %c0_5 = arith.constant 0 : index
    %5 = vector.load %arg3[%c0_4, %c0_5] : memref<16x512xbf16, #tpu.memory_space<vmem>>, vector<16x512xbf16>
    %cst = arith.constant dense<0.000000e+00> : vector<64x512xf32>
    %6 = tpu.matmul %4, %5, %cst {dimension_numbers = #tpu.dot_dimension_numbers<[1], [0], [0], [1], [0, 0, 1, 1], [], []>} : vector<64x16xbf16>, vector<16x512xbf16>, vector<64x512xf32> -> vector<64x512xf32>
    %c0_6 = arith.constant 0 : index
    %c0_7 = arith.constant 0 : index
    %7 = vector.load %arg5[%c0_6, %c0_7] : memref<1x512xf32, #tpu.memory_space<vmem>>, vector<1x512xf32>
    %8 = vector.broadcast %7 : vector<1x512xf32> to vector<64x512xf32>
    %9 = arith.addf %6, %8 : vector<64x512xf32>
    %c0_8 = arith.constant 0 : index
    %c0_9 = arith.constant 0 : index
    %10 = vector.load %arg9[%c0_8, %c0_9] : memref<64x512xf32, #tpu.memory_space<vmem>>, vector<64x512xf32>
    tpu.vector_store %arg9[%c0_8, %c0_9], %9 {strides = array<i32>} : memref<64x512xf32, #tpu.memory_space<vmem>>, vector<64x512xf32>,
    %c0_10 = arith.constant 0 : index
    %c0_11 = arith.constant 0 : index
    %11 = vector.load %arg7[%c0_10, %c0_11] : memref<8x128xf32, #tpu.memory_space<vmem>>, vector<8x128xf32>
    %c0_12 = arith.constant 0 : index
    %c0_13 = arith.constant 0 : index
    %12 = vector.load %arg8[%c0_12, %c0_13] : memref<8x128xf32, #tpu.memory_space<vmem>>, vector<8x128xf32>
    %c0_i32_14 = arith.constant 0 : i32
    %13 = arith.truncf %11 : vector<8x128xf32> to vector<8x128xbf16>
    %c8_i32 = arith.constant 8 : i32
    %14 = arith.muli %c0_i32_14, %c8_i32 : i32
    %15 = tpu.assume_multiple %14, 8 : i32
    %16 = arith.index_cast %15 : i32 to index
    %c0_15 = arith.constant 0 : index
    %17 = vector.load %arg9[%16, %c0_15] : memref<64x512xf32, #tpu.memory_space<vmem>>, vector<8x128xf32>
    %c0_16 = arith.constant 0 : index
    %c0_17 = arith.constant 0 : index
    %18 = vector.load %arg4[%c0_16, %c0_17] : memref<128x512xbf16, #tpu.memory_space<vmem>>, vector<128x128xbf16>
    %cst_18 = arith.constant dense<0.000000e+00> : vector<8x128xf32>
    %19 = tpu.matmul %13, %18, %cst_18 {dimension_numbers = #tpu.dot_dimension_numbers<[1], [0], [0], [1], [0, 0, 1, 1], [], []>} : vector<8x128xbf16>, vector<128x128xbf16>, vector<8x128xf32> -> vector<8x128xf32>
    %20 = arith.addf %17, %19 : vector<8x128xf32>
    %21 = arith.negf %20 : vector<8x128xf32>
    %22 = math.exp %21 : vector<8x128xf32>
    %cst_19 = arith.constant 1.000000e+00 : f32
    %23 = vector.broadcast %cst_19 : f32 to vector<8x128xf32>
    %24 = arith.addf %23, %22 : vector<8x128xf32>
    %25 = arith.divf %23, %24 : vector<8x128xf32>
    %26 = arith.index_cast %15 : i32 to index
    %c128 = arith.constant 128 : index
    %27 = vector.load %arg9[%26, %c128] : memref<64x512xf32, #tpu.memory_space<vmem>>, vector<8x128xf32>
    %c0_20 = arith.constant 0 : index
    %c128_21 = arith.constant 128 : index
    %28 = vector.load %arg4[%c0_20, %c128_21] : memref<128x512xbf16, #tpu.memory_space<vmem>>, vector<128x128xbf16>
    %cst_22 = arith.constant dense<0.000000e+00> : vector<8x128xf32>
    %29 = tpu.matmul %13, %28, %cst_22 {dimension_numbers = #tpu.dot_dimension_numbers<[1], [0], [0], [1], [0, 0, 1, 1], [], []>} : vector<8x128xbf16>, vector<128x128xbf16>, vector<8x128xf32> -> vector<8x128xf32>
    %30 = arith.addf %27, %29 : vector<8x128xf32>
    %31 = arith.negf %30 : vector<8x128xf32>
    %32 = math.exp %31 : vector<8x128xf32>
    %cst_23 = arith.constant 1.000000e+00 : f32
    %33 = vector.broadcast %cst_23 : f32 to vector<8x128xf32>
    %34 = arith.addf %33, %32 : vector<8x128xf32>
    %35 = arith.divf %33, %34 : vector<8x128xf32>
    %36 = arith.mulf %35, %12 : vector<8x128xf32>
    %37 = arith.index_cast %15 : i32 to index
    %c256 = arith.constant 256 : index
    %38 = vector.load %arg9[%37, %c256] : memref<64x512xf32, #tpu.memory_space<vmem>>, vector<8x128xf32>
    %c0_24 = arith.constant 0 : index
    %c256_25 = arith.constant 256 : index
    %39 = vector.load %arg4[%c0_24, %c256_25] : memref<128x512xbf16, #tpu.memory_space<vmem>>, vector<128x128xbf16>
    %cst_26 = arith.constant dense<0.000000e+00> : vector<8x128xf32>
    %40 = tpu.matmul %13, %39, %cst_26 {dimension_numbers = #tpu.dot_dimension_numbers<[1], [0], [0], [1], [0, 0, 1, 1], [], []>} : vector<8x128xbf16>, vector<128x128xbf16>, vector<8x128xf32> -> vector<8x128xf32>
    %41 = arith.addf %38, %40 : vector<8x128xf32>
    %42 = math.tanh %41 : vector<8x128xf32>
    %43 = arith.mulf %25, %42 : vector<8x128xf32>
    %44 = arith.addf %36, %43 : vector<8x128xf32>
    %45 = arith.index_cast %15 : i32 to index
    %c384 = arith.constant 384 : index
    %46 = vector.load %arg9[%45, %c384] : memref<64x512xf32, #tpu.memory_space<vmem>>, vector<8x128xf32>
    %c0_27 = arith.constant 0 : index
    %c384_28 = arith.constant 384 : index
    %47 = vector.load %arg4[%c0_27, %c384_28] : memref<128x512xbf16, #tpu.memory_space<vmem>>, vector<128x128xbf16>
    %cst_29 = arith.constant dense<0.000000e+00> : vector<8x128xf32>
    %48 = tpu.matmul %13, %47, %cst_29 {dimension_numbers = #tpu.dot_dimension_numbers<[1], [0], [0], [1], [0, 0, 1, 1], [], []>} : vector<8x128xbf16>, vector<128x128xbf16>, vector<8x128xf32> -> vector<8x128xf32>
    %49 = arith.addf %46, %48 : vector<8x128xf32>
    %50 = arith.negf %49 : vector<8x128xf32>
    %51 = math.exp %50 : vector<8x128xf32>
    %cst_30 = arith.constant 1.000000e+00 : f32
    %52 = vector.broadcast %cst_30 : f32 to vector<8x128xf32>
    %53 = arith.addf %52, %51 : vector<8x128xf32>
    %54 = arith.divf %52, %53 : vector<8x128xf32>
    %55 = math.tanh %44 : vector<8x128xf32>
    %56 = arith.mulf %54, %55 : vector<8x128xf32>
    %c1_i32 = arith.constant 1 : i32
    %57 = arith.truncf %56 : vector<8x128xf32> to vector<8x128xbf16>
    %c8_i32_31 = arith.constant 8 : i32
    %58 = arith.muli %c1_i32, %c8_i32_31 : i32
    %59 = tpu.assume_multiple %58, 8 : i32
    %60 = arith.index_cast %59 : i32 to index
    %c0_32 = arith.constant 0 : index
    %61 = vector.load %arg9[%60, %c0_32] : memref<64x512xf32, #tpu.memory_space<vmem>>, vector<8x128xf32>
    %c0_33 = arith.constant 0 : index
    %c0_34 = arith.constant 0 : index
    %62 = vector.load %arg4[%c0_33, %c0_34] : memref<128x512xbf16, #tpu.memory_space<vmem>>, vector<128x128xbf16>
    %cst_35 = arith.constant dense<0.000000e+00> : vector<8x128xf32>
    %63 = tpu.matmul %57, %62, %cst_35 {dimension_numbers = #tpu.dot_dimension_numbers<[1], [0], [0], [1], [0, 0, 1, 1], [], []>} : vector<8x128xbf16>, vector<128x128xbf16>, vector<8x128xf32> -> vector<8x128xf32>
    %64 = arith.addf %61, %63 : vector<8x128xf32>
    %65 = arith.negf %64 : vector<8x128xf32>
    %66 = math.exp %65 : vector<8x128xf32>
    %cst_36 = arith.constant 1.000000e+00 : f32
    %67 = vector.broadcast %cst_36 : f32 to vector<8x128xf32>
    %68 = arith.addf %67, %66 : vector<8x128xf32>
    %69 = arith.divf %67, %68 : vector<8x128xf32>
    %70 = arith.index_cast %59 : i32 to index
    %c128_37 = arith.constant 128 : index
    %71 = vector.load %arg9[%70, %c128_37] : memref<64x512xf32, #tpu.memory_space<vmem>>, vector<8x128xf32>
    %c0_38 = arith.constant 0 : index
    %c128_39 = arith.constant 128 : index
    %72 = vector.load %arg4[%c0_38, %c128_39] : memref<128x512xbf16, #tpu.memory_space<vmem>>, vector<128x128xbf16>
    %cst_40 = arith.constant dense<0.000000e+00> : vector<8x128xf32>
    %73 = tpu.matmul %57, %72, %cst_40 {dimension_numbers = #tpu.dot_dimension_numbers<[1], [0], [0], [1], [0, 0, 1, 1], [], []>} : vector<8x128xbf16>, vector<128x128xbf16>, vector<8x128xf32> -> vector<8x128xf32>
    %74 = arith.addf %71, %73 : vector<8x128xf32>
    %75 = arith.negf %74 : vector<8x128xf32>
    %76 = math.exp %75 : vector<8x128xf32>
    %cst_41 = arith.constant 1.000000e+00 : f32
    %77 = vector.broadcast %cst_41 : f32 to vector<8x128xf32>
    %78 = arith.addf %77, %76 : vector<8x128xf32>
    %79 = arith.divf %77, %78 : vector<8x128xf32>
    %80 = arith.mulf %79, %44 : vector<8x128xf32>
    %81 = arith.index_cast %59 : i32 to index
    %c256_42 = arith.constant 256 : index
    %82 = vector.load %arg9[%81, %c256_42] : memref<64x512xf32, #tpu.memory_space<vmem>>, vector<8x128xf32>
    %c0_43 = arith.constant 0 : index
    %c256_44 = arith.constant 256 : index
    %83 = vector.load %arg4[%c0_43, %c256_44] : memref<128x512xbf16, #tpu.memory_space<vmem>>, vector<128x128xbf16>
    %cst_45 = arith.constant dense<0.000000e+00> : vector<8x128xf32>
    %84 = tpu.matmul %57, %83, %cst_45 {dimension_numbers = #tpu.dot_dimension_numbers<[1], [0], [0], [1], [0, 0, 1, 1], [], []>} : vector<8x128xbf16>, vector<128x128xbf16>, vector<8x128xf32> -> vector<8x128xf32>
    %85 = arith.addf %82, %84 : vector<8x128xf32>
    %86 = math.tanh %85 : vector<8x128xf32>
    %87 = arith.mulf %69, %86 : vector<8x128xf32>
    %88 = arith.addf %80, %87 : vector<8x128xf32>
    %89 = arith.index_cast %59 : i32 to index
    %c384_46 = arith.constant 384 : index
    %90 = vector.load %arg9[%89, %c384_46] : memref<64x512xf32, #tpu.memory_space<vmem>>, vector<8x128xf32>
    %c0_47 = arith.constant 0 : index
    %c384_48 = arith.constant 384 : index
    %91 = vector.load %arg4[%c0_47, %c384_48] : memref<128x512xbf16, #tpu.memory_space<vmem>>, vector<128x128xbf16>
    %cst_49 = arith.constant dense<0.000000e+00> : vector<8x128xf32>
    %92 = tpu.matmul %57, %91, %cst_49 {dimension_numbers = #tpu.dot_dimension_numbers<[1], [0], [0], [1], [0, 0, 1, 1], [], []>} : vector<8x128xbf16>, vector<128x128xbf16>, vector<8x128xf32> -> vector<8x128xf32>
    %93 = arith.addf %90, %92 : vector<8x128xf32>
    %94 = arith.negf %93 : vector<8x128xf32>
    %95 = math.exp %94 : vector<8x128xf32>
    %cst_50 = arith.constant 1.000000e+00 : f32
    %96 = vector.broadcast %cst_50 : f32 to vector<8x128xf32>
    %97 = arith.addf %96, %95 : vector<8x128xf32>
    %98 = arith.divf %96, %97 : vector<8x128xf32>
    %99 = math.tanh %88 : vector<8x128xf32>
    %100 = arith.mulf %98, %99 : vector<8x128xf32>
    %c2_i32 = arith.constant 2 : i32
    %101 = arith.truncf %100 : vector<8x128xf32> to vector<8x128xbf16>
    %c8_i32_51 = arith.constant 8 : i32
    %102 = arith.muli %c2_i32, %c8_i32_51 : i32
    %103 = tpu.assume_multiple %102, 8 : i32
    %104 = arith.index_cast %103 : i32 to index
    %c0_52 = arith.constant 0 : index
    %105 = vector.load %arg9[%104, %c0_52] : memref<64x512xf32, #tpu.memory_space<vmem>>, vector<8x128xf32>
    %c0_53 = arith.constant 0 : index
    %c0_54 = arith.constant 0 : index
    %106 = vector.load %arg4[%c0_53, %c0_54] : memref<128x512xbf16, #tpu.memory_space<vmem>>, vector<128x128xbf16>
    %cst_55 = arith.constant dense<0.000000e+00> : vector<8x128xf32>
    %107 = tpu.matmul %101, %106, %cst_55 {dimension_numbers = #tpu.dot_dimension_numbers<[1], [0], [0], [1], [0, 0, 1, 1], [], []>} : vector<8x128xbf16>, vector<128x128xbf16>, vector<8x128xf32> -> vector<8x128xf32>
    %108 = arith.addf %105, %107 : vector<8x128xf32>
    %109 = arith.negf %108 : vector<8x128xf32>
    %110 = math.exp %109 : vector<8x128xf32>
    %cst_56 = arith.constant 1.000000e+00 : f32
    %111 = vector.broadcast %cst_56 : f32 to vector<8x128xf32>
    %112 = arith.addf %111, %110 : vector<8x128xf32>
    %113 = arith.divf %111, %112 : vector<8x128xf32>
    %114 = arith.index_cast %103 : i32 to index
    %c128_57 = arith.constant 128 : index
    %115 = vector.load %arg9[%114, %c128_57] : memref<64x512xf32, #tpu.memory_space<vmem>>, vector<8x128xf32>
    %c0_58 = arith.constant 0 : index
    %c128_59 = arith.constant 128 : index
    %116 = vector.load %arg4[%c0_58, %c128_59] : memref<128x512xbf16, #tpu.memory_space<vmem>>, vector<128x128xbf16>
    %cst_60 = arith.constant dense<0.000000e+00> : vector<8x128xf32>
    %117 = tpu.matmul %101, %116, %cst_60 {dimension_numbers = #tpu.dot_dimension_numbers<[1], [0], [0], [1], [0, 0, 1, 1], [], []>} : vector<8x128xbf16>, vector<128x128xbf16>, vector<8x128xf32> -> vector<8x128xf32>
    %118 = arith.addf %115, %117 : vector<8x128xf32>
    %119 = arith.negf %118 : vector<8x128xf32>
    %120 = math.exp %119 : vector<8x128xf32>
    %cst_61 = arith.constant 1.000000e+00 : f32
    %121 = vector.broadcast %cst_61 : f32 to vector<8x128xf32>
    %122 = arith.addf %121, %120 : vector<8x128xf32>
    %123 = arith.divf %121, %122 : vector<8x128xf32>
    %124 = arith.mulf %123, %88 : vector<8x128xf32>
    %125 = arith.index_cast %103 : i32 to index
    %c256_62 = arith.constant 256 : index
    %126 = vector.load %arg9[%125, %c256_62] : memref<64x512xf32, #tpu.memory_space<vmem>>, vector<8x128xf32>
    %c0_63 = arith.constant 0 : index
    %c256_64 = arith.constant 256 : index
    %127 = vector.load %arg4[%c0_63, %c256_64] : memref<128x512xbf16, #tpu.memory_space<vmem>>, vector<128x128xbf16>
    %cst_65 = arith.constant dense<0.000000e+00> : vector<8x128xf32>
    %128 = tpu.matmul %101, %127, %cst_65 {dimension_numbers = #tpu.dot_dimension_numbers<[1], [0], [0], [1], [0, 0, 1, 1], [], []>} : vector<8x128xbf16>, vector<128x128xbf16>, vector<8x128xf32> -> vector<8x128xf32>
    %129 = arith.addf %126, %128 : vector<8x128xf32>
    %130 = math.tanh %129 : vector<8x128xf32>
    %131 = arith.mulf %113, %130 : vector<8x128xf32>
    %132 = arith.addf %124, %131 : vector<8x128xf32>
    %133 = arith.index_cast %103 : i32 to index
    %c384_66 = arith.constant 384 : index
    %134 = vector.load %arg9[%133, %c384_66] : memref<64x512xf32, #tpu.memory_space<vmem>>, vector<8x128xf32>
    %c0_67 = arith.constant 0 : index
    %c384_68 = arith.constant 384 : index
    %135 = vector.load %arg4[%c0_67, %c384_68] : memref<128x512xbf16, #tpu.memory_space<vmem>>, vector<128x128xbf16>
    %cst_69 = arith.constant dense<0.000000e+00> : vector<8x128xf32>
    %136 = tpu.matmul %101, %135, %cst_69 {dimension_numbers = #tpu.dot_dimension_numbers<[1], [0], [0], [1], [0, 0, 1, 1], [], []>} : vector<8x128xbf16>, vector<128x128xbf16>, vector<8x128xf32> -> vector<8x128xf32>
    %137 = arith.addf %134, %136 : vector<8x128xf32>
    %138 = arith.negf %137 : vector<8x128xf32>
    %139 = math.exp %138 : vector<8x128xf32>
    %cst_70 = arith.constant 1.000000e+00 : f32
    %140 = vector.broadcast %cst_70 : f32 to vector<8x128xf32>
    %141 = arith.addf %140, %139 : vector<8x128xf32>
    %142 = arith.divf %140, %141 : vector<8x128xf32>
    %143 = math.tanh %132 : vector<8x128xf32>
    %144 = arith.mulf %142, %143 : vector<8x128xf32>
    %c3_i32 = arith.constant 3 : i32
    %145 = arith.truncf %144 : vector<8x128xf32> to vector<8x128xbf16>
    %c8_i32_71 = arith.constant 8 : i32
    %146 = arith.muli %c3_i32, %c8_i32_71 : i32
    %147 = tpu.assume_multiple %146, 8 : i32
    %148 = arith.index_cast %147 : i32 to index
    %c0_72 = arith.constant 0 : index
    %149 = vector.load %arg9[%148, %c0_72] : memref<64x512xf32, #tpu.memory_space<vmem>>, vector<8x128xf32>
    %c0_73 = arith.constant 0 : index
    %c0_74 = arith.constant 0 : index
    %150 = vector.load %arg4[%c0_73, %c0_74] : memref<128x512xbf16, #tpu.memory_space<vmem>>, vector<128x128xbf16>
    %cst_75 = arith.constant dense<0.000000e+00> : vector<8x128xf32>
    %151 = tpu.matmul %145, %150, %cst_75 {dimension_numbers = #tpu.dot_dimension_numbers<[1], [0], [0], [1], [0, 0, 1, 1], [], []>} : vector<8x128xbf16>, vector<128x128xbf16>, vector<8x128xf32> -> vector<8x128xf32>
    %152 = arith.addf %149, %151 : vector<8x128xf32>
    %153 = arith.negf %152 : vector<8x128xf32>
    %154 = math.exp %153 : vector<8x128xf32>
    %cst_76 = arith.constant 1.000000e+00 : f32
    %155 = vector.broadcast %cst_76 : f32 to vector<8x128xf32>
    %156 = arith.addf %155, %154 : vector<8x128xf32>
    %157 = arith.divf %155, %156 : vector<8x128xf32>
    %158 = arith.index_cast %147 : i32 to index
    %c128_77 = arith.constant 128 : index
    %159 = vector.load %arg9[%158, %c128_77] : memref<64x512xf32, #tpu.memory_space<vmem>>, vector<8x128xf32>
    %c0_78 = arith.constant 0 : index
    %c128_79 = arith.constant 128 : index
    %160 = vector.load %arg4[%c0_78, %c128_79] : memref<128x512xbf16, #tpu.memory_space<vmem>>, vector<128x128xbf16>
    %cst_80 = arith.constant dense<0.000000e+00> : vector<8x128xf32>
    %161 = tpu.matmul %145, %160, %cst_80 {dimension_numbers = #tpu.dot_dimension_numbers<[1], [0], [0], [1], [0, 0, 1, 1], [], []>} : vector<8x128xbf16>, vector<128x128xbf16>, vector<8x128xf32> -> vector<8x128xf32>
    %162 = arith.addf %159, %161 : vector<8x128xf32>
    %163 = arith.negf %162 : vector<8x128xf32>
    %164 = math.exp %163 : vector<8x128xf32>
    %cst_81 = arith.constant 1.000000e+00 : f32
    %165 = vector.broadcast %cst_81 : f32 to vector<8x128xf32>
    %166 = arith.addf %165, %164 : vector<8x128xf32>
    %167 = arith.divf %165, %166 : vector<8x128xf32>
    %168 = arith.mulf %167, %132 : vector<8x128xf32>
    %169 = arith.index_cast %147 : i32 to index
    %c256_82 = arith.constant 256 : index
    %170 = vector.load %arg9[%169, %c256_82] : memref<64x512xf32, #tpu.memory_space<vmem>>, vector<8x128xf32>
    %c0_83 = arith.constant 0 : index
    %c256_84 = arith.constant 256 : index
    %171 = vector.load %arg4[%c0_83, %c256_84] : memref<128x512xbf16, #tpu.memory_space<vmem>>, vector<128x128xbf16>
    %cst_85 = arith.constant dense<0.000000e+00> : vector<8x128xf32>
    %172 = tpu.matmul %145, %171, %cst_85 {dimension_numbers = #tpu.dot_dimension_numbers<[1], [0], [0], [1], [0, 0, 1, 1], [], []>} : vector<8x128xbf16>, vector<128x128xbf16>, vector<8x128xf32> -> vector<8x128xf32>
    %173 = arith.addf %170, %172 : vector<8x128xf32>
    %174 = math.tanh %173 : vector<8x128xf32>
    %175 = arith.mulf %157, %174 : vector<8x128xf32>
    %176 = arith.addf %168, %175 : vector<8x128xf32>
    %177 = arith.index_cast %147 : i32 to index
    %c384_86 = arith.constant 384 : index
    %178 = vector.load %arg9[%177, %c384_86] : memref<64x512xf32, #tpu.memory_space<vmem>>, vector<8x128xf32>
    %c0_87 = arith.constant 0 : index
    %c384_88 = arith.constant 384 : index
    %179 = vector.load %arg4[%c0_87, %c384_88] : memref<128x512xbf16, #tpu.memory_space<vmem>>, vector<128x128xbf16>
    %cst_89 = arith.constant dense<0.000000e+00> : vector<8x128xf32>
    %180 = tpu.matmul %145, %179, %cst_89 {dimension_numbers = #tpu.dot_dimension_numbers<[1], [0], [0], [1], [0, 0, 1, 1], [], []>} : vector<8x128xbf16>, vector<128x128xbf16>, vector<8x128xf32> -> vector<8x128xf32>
    %181 = arith.addf %178, %180 : vector<8x128xf32>
    %182 = arith.negf %181 : vector<8x128xf32>
    %183 = math.exp %182 : vector<8x128xf32>
    %cst_90 = arith.constant 1.000000e+00 : f32
    %184 = vector.broadcast %cst_90 : f32 to vector<8x128xf32>
    %185 = arith.addf %184, %183 : vector<8x128xf32>
    %186 = arith.divf %184, %185 : vector<8x128xf32>
    %187 = math.tanh %176 : vector<8x128xf32>
    %188 = arith.mulf %186, %187 : vector<8x128xf32>
    %c4_i32 = arith.constant 4 : i32
    %189 = arith.truncf %188 : vector<8x128xf32> to vector<8x128xbf16>
    %c8_i32_91 = arith.constant 8 : i32
    %190 = arith.muli %c4_i32, %c8_i32_91 : i32
    %191 = tpu.assume_multiple %190, 8 : i32
    %192 = arith.index_cast %191 : i32 to index
    %c0_92 = arith.constant 0 : index
    %193 = vector.load %arg9[%192, %c0_92] : memref<64x512xf32, #tpu.memory_space<vmem>>, vector<8x128xf32>
    %c0_93 = arith.constant 0 : index
    %c0_94 = arith.constant 0 : index
    %194 = vector.load %arg4[%c0_93, %c0_94] : memref<128x512xbf16, #tpu.memory_space<vmem>>, vector<128x128xbf16>
    %cst_95 = arith.constant dense<0.000000e+00> : vector<8x128xf32>
    %195 = tpu.matmul %189, %194, %cst_95 {dimension_numbers = #tpu.dot_dimension_numbers<[1], [0], [0], [1], [0, 0, 1, 1], [], []>} : vector<8x128xbf16>, vector<128x128xbf16>, vector<8x128xf32> -> vector<8x128xf32>
    %196 = arith.addf %193, %195 : vector<8x128xf32>
    %197 = arith.negf %196 : vector<8x128xf32>
    %198 = math.exp %197 : vector<8x128xf32>
    %cst_96 = arith.constant 1.000000e+00 : f32
    %199 = vector.broadcast %cst_96 : f32 to vector<8x128xf32>
    %200 = arith.addf %199, %198 : vector<8x128xf32>
    %201 = arith.divf %199, %200 : vector<8x128xf32>
    %202 = arith.index_cast %191 : i32 to index
    %c128_97 = arith.constant 128 : index
    %203 = vector.load %arg9[%202, %c128_97] : memref<64x512xf32, #tpu.memory_space<vmem>>, vector<8x128xf32>
    %c0_98 = arith.constant 0 : index
    %c128_99 = arith.constant 128 : index
    %204 = vector.load %arg4[%c0_98, %c128_99] : memref<128x512xbf16, #tpu.memory_space<vmem>>, vector<128x128xbf16>
    %cst_100 = arith.constant dense<0.000000e+00> : vector<8x128xf32>
    %205 = tpu.matmul %189, %204, %cst_100 {dimension_numbers = #tpu.dot_dimension_numbers<[1], [0], [0], [1], [0, 0, 1, 1], [], []>} : vector<8x128xbf16>, vector<128x128xbf16>, vector<8x128xf32> -> vector<8x128xf32>
    %206 = arith.addf %203, %205 : vector<8x128xf32>
    %207 = arith.negf %206 : vector<8x128xf32>
    %208 = math.exp %207 : vector<8x128xf32>
    %cst_101 = arith.constant 1.000000e+00 : f32
    %209 = vector.broadcast %cst_101 : f32 to vector<8x128xf32>
    %210 = arith.addf %209, %208 : vector<8x128xf32>
    %211 = arith.divf %209, %210 : vector<8x128xf32>
    %212 = arith.mulf %211, %176 : vector<8x128xf32>
    %213 = arith.index_cast %191 : i32 to index
    %c256_102 = arith.constant 256 : index
    %214 = vector.load %arg9[%213, %c256_102] : memref<64x512xf32, #tpu.memory_space<vmem>>, vector<8x128xf32>
    %c0_103 = arith.constant 0 : index
    %c256_104 = arith.constant 256 : index
    %215 = vector.load %arg4[%c0_103, %c256_104] : memref<128x512xbf16, #tpu.memory_space<vmem>>, vector<128x128xbf16>
    %cst_105 = arith.constant dense<0.000000e+00> : vector<8x128xf32>
    %216 = tpu.matmul %189, %215, %cst_105 {dimension_numbers = #tpu.dot_dimension_numbers<[1], [0], [0], [1], [0, 0, 1, 1], [], []>} : vector<8x128xbf16>, vector<128x128xbf16>, vector<8x128xf32> -> vector<8x128xf32>
    %217 = arith.addf %214, %216 : vector<8x128xf32>
    %218 = math.tanh %217 : vector<8x128xf32>
    %219 = arith.mulf %201, %218 : vector<8x128xf32>
    %220 = arith.addf %212, %219 : vector<8x128xf32>
    %221 = arith.index_cast %191 : i32 to index
    %c384_106 = arith.constant 384 : index
    %222 = vector.load %arg9[%221, %c384_106] : memref<64x512xf32, #tpu.memory_space<vmem>>, vector<8x128xf32>
    %c0_107 = arith.constant 0 : index
    %c384_108 = arith.constant 384 : index
    %223 = vector.load %arg4[%c0_107, %c384_108] : memref<128x512xbf16, #tpu.memory_space<vmem>>, vector<128x128xbf16>
    %cst_109 = arith.constant dense<0.000000e+00> : vector<8x128xf32>
    %224 = tpu.matmul %189, %223, %cst_109 {dimension_numbers = #tpu.dot_dimension_numbers<[1], [0], [0], [1], [0, 0, 1, 1], [], []>} : vector<8x128xbf16>, vector<128x128xbf16>, vector<8x128xf32> -> vector<8x128xf32>
    %225 = arith.addf %222, %224 : vector<8x128xf32>
    %226 = arith.negf %225 : vector<8x128xf32>
    %227 = math.exp %226 : vector<8x128xf32>
    %cst_110 = arith.constant 1.000000e+00 : f32
    %228 = vector.broadcast %cst_110 : f32 to vector<8x128xf32>
    %229 = arith.addf %228, %227 : vector<8x128xf32>
    %230 = arith.divf %228, %229 : vector<8x128xf32>
    %231 = math.tanh %220 : vector<8x128xf32>
    %232 = arith.mulf %230, %231 : vector<8x128xf32>
    %c5_i32 = arith.constant 5 : i32
    %233 = arith.truncf %232 : vector<8x128xf32> to vector<8x128xbf16>
    %c8_i32_111 = arith.constant 8 : i32
    %234 = arith.muli %c5_i32, %c8_i32_111 : i32
    %235 = tpu.assume_multiple %234, 8 : i32
    %236 = arith.index_cast %235 : i32 to index
    %c0_112 = arith.constant 0 : index
    %237 = vector.load %arg9[%236, %c0_112] : memref<64x512xf32, #tpu.memory_space<vmem>>, vector<8x128xf32>
    %c0_113 = arith.constant 0 : index
    %c0_114 = arith.constant 0 : index
    %238 = vector.load %arg4[%c0_113, %c0_114] : memref<128x512xbf16, #tpu.memory_space<vmem>>, vector<128x128xbf16>
    %cst_115 = arith.constant dense<0.000000e+00> : vector<8x128xf32>
    %239 = tpu.matmul %233, %238, %cst_115 {dimension_numbers = #tpu.dot_dimension_numbers<[1], [0], [0], [1], [0, 0, 1, 1], [], []>} : vector<8x128xbf16>, vector<128x128xbf16>, vector<8x128xf32> -> vector<8x128xf32>
    %240 = arith.addf %237, %239 : vector<8x128xf32>
    %241 = arith.negf %240 : vector<8x128xf32>
    %242 = math.exp %241 : vector<8x128xf32>
    %cst_116 = arith.constant 1.000000e+00 : f32
    %243 = vector.broadcast %cst_116 : f32 to vector<8x128xf32>
    %244 = arith.addf %243, %242 : vector<8x128xf32>
    %245 = arith.divf %243, %244 : vector<8x128xf32>
    %246 = arith.index_cast %235 : i32 to index
    %c128_117 = arith.constant 128 : index
    %247 = vector.load %arg9[%246, %c128_117] : memref<64x512xf32, #tpu.memory_space<vmem>>, vector<8x128xf32>
    %c0_118 = arith.constant 0 : index
    %c128_119 = arith.constant 128 : index
    %248 = vector.load %arg4[%c0_118, %c128_119] : memref<128x512xbf16, #tpu.memory_space<vmem>>, vector<128x128xbf16>
    %cst_120 = arith.constant dense<0.000000e+00> : vector<8x128xf32>
    %249 = tpu.matmul %233, %248, %cst_120 {dimension_numbers = #tpu.dot_dimension_numbers<[1], [0], [0], [1], [0, 0, 1, 1], [], []>} : vector<8x128xbf16>, vector<128x128xbf16>, vector<8x128xf32> -> vector<8x128xf32>
    %250 = arith.addf %247, %249 : vector<8x128xf32>
    %251 = arith.negf %250 : vector<8x128xf32>
    %252 = math.exp %251 : vector<8x128xf32>
    %cst_121 = arith.constant 1.000000e+00 : f32
    %253 = vector.broadcast %cst_121 : f32 to vector<8x128xf32>
    %254 = arith.addf %253, %252 : vector<8x128xf32>
    %255 = arith.divf %253, %254 : vector<8x128xf32>
    %256 = arith.mulf %255, %220 : vector<8x128xf32>
    %257 = arith.index_cast %235 : i32 to index
    %c256_122 = arith.constant 256 : index
    %258 = vector.load %arg9[%257, %c256_122] : memref<64x512xf32, #tpu.memory_space<vmem>>, vector<8x128xf32>
    %c0_123 = arith.constant 0 : index
    %c256_124 = arith.constant 256 : index
    %259 = vector.load %arg4[%c0_123, %c256_124] : memref<128x512xbf16, #tpu.memory_space<vmem>>, vector<128x128xbf16>
    %cst_125 = arith.constant dense<0.000000e+00> : vector<8x128xf32>
    %260 = tpu.matmul %233, %259, %cst_125 {dimension_numbers = #tpu.dot_dimension_numbers<[1], [0], [0], [1], [0, 0, 1, 1], [], []>} : vector<8x128xbf16>, vector<128x128xbf16>, vector<8x128xf32> -> vector<8x128xf32>
    %261 = arith.addf %258, %260 : vector<8x128xf32>
    %262 = math.tanh %261 : vector<8x128xf32>
    %263 = arith.mulf %245, %262 : vector<8x128xf32>
    %264 = arith.addf %256, %263 : vector<8x128xf32>
    %265 = arith.index_cast %235 : i32 to index
    %c384_126 = arith.constant 384 : index
    %266 = vector.load %arg9[%265, %c384_126] : memref<64x512xf32, #tpu.memory_space<vmem>>, vector<8x128xf32>
    %c0_127 = arith.constant 0 : index
    %c384_128 = arith.constant 384 : index
    %267 = vector.load %arg4[%c0_127, %c384_128] : memref<128x512xbf16, #tpu.memory_space<vmem>>, vector<128x128xbf16>
    %cst_129 = arith.constant dense<0.000000e+00> : vector<8x128xf32>
    %268 = tpu.matmul %233, %267, %cst_129 {dimension_numbers = #tpu.dot_dimension_numbers<[1], [0], [0], [1], [0, 0, 1, 1], [], []>} : vector<8x128xbf16>, vector<128x128xbf16>, vector<8x128xf32> -> vector<8x128xf32>
    %269 = arith.addf %266, %268 : vector<8x128xf32>
    %270 = arith.negf %269 : vector<8x128xf32>
    %271 = math.exp %270 : vector<8x128xf32>
    %cst_130 = arith.constant 1.000000e+00 : f32
    %272 = vector.broadcast %cst_130 : f32 to vector<8x128xf32>
    %273 = arith.addf %272, %271 : vector<8x128xf32>
    %274 = arith.divf %272, %273 : vector<8x128xf32>
    %275 = math.tanh %264 : vector<8x128xf32>
    %276 = arith.mulf %274, %275 : vector<8x128xf32>
    %c6_i32 = arith.constant 6 : i32
    %277 = arith.truncf %276 : vector<8x128xf32> to vector<8x128xbf16>
    %c8_i32_131 = arith.constant 8 : i32
    %278 = arith.muli %c6_i32, %c8_i32_131 : i32
    %279 = tpu.assume_multiple %278, 8 : i32
    %280 = arith.index_cast %279 : i32 to index
    %c0_132 = arith.constant 0 : index
    %281 = vector.load %arg9[%280, %c0_132] : memref<64x512xf32, #tpu.memory_space<vmem>>, vector<8x128xf32>
    %c0_133 = arith.constant 0 : index
    %c0_134 = arith.constant 0 : index
    %282 = vector.load %arg4[%c0_133, %c0_134] : memref<128x512xbf16, #tpu.memory_space<vmem>>, vector<128x128xbf16>
    %cst_135 = arith.constant dense<0.000000e+00> : vector<8x128xf32>
    %283 = tpu.matmul %277, %282, %cst_135 {dimension_numbers = #tpu.dot_dimension_numbers<[1], [0], [0], [1], [0, 0, 1, 1], [], []>} : vector<8x128xbf16>, vector<128x128xbf16>, vector<8x128xf32> -> vector<8x128xf32>
    %284 = arith.addf %281, %283 : vector<8x128xf32>
    %285 = arith.negf %284 : vector<8x128xf32>
    %286 = math.exp %285 : vector<8x128xf32>
    %cst_136 = arith.constant 1.000000e+00 : f32
    %287 = vector.broadcast %cst_136 : f32 to vector<8x128xf32>
    %288 = arith.addf %287, %286 : vector<8x128xf32>
    %289 = arith.divf %287, %288 : vector<8x128xf32>
    %290 = arith.index_cast %279 : i32 to index
    %c128_137 = arith.constant 128 : index
    %291 = vector.load %arg9[%290, %c128_137] : memref<64x512xf32, #tpu.memory_space<vmem>>, vector<8x128xf32>
    %c0_138 = arith.constant 0 : index
    %c128_139 = arith.constant 128 : index
    %292 = vector.load %arg4[%c0_138, %c128_139] : memref<128x512xbf16, #tpu.memory_space<vmem>>, vector<128x128xbf16>
    %cst_140 = arith.constant dense<0.000000e+00> : vector<8x128xf32>
    %293 = tpu.matmul %277, %292, %cst_140 {dimension_numbers = #tpu.dot_dimension_numbers<[1], [0], [0], [1], [0, 0, 1, 1], [], []>} : vector<8x128xbf16>, vector<128x128xbf16>, vector<8x128xf32> -> vector<8x128xf32>
    %294 = arith.addf %291, %293 : vector<8x128xf32>
    %295 = arith.negf %294 : vector<8x128xf32>
    %296 = math.exp %295 : vector<8x128xf32>
    %cst_141 = arith.constant 1.000000e+00 : f32
    %297 = vector.broadcast %cst_141 : f32 to vector<8x128xf32>
    %298 = arith.addf %297, %296 : vector<8x128xf32>
    %299 = arith.divf %297, %298 : vector<8x128xf32>
    %300 = arith.mulf %299, %264 : vector<8x128xf32>
    %301 = arith.index_cast %279 : i32 to index
    %c256_142 = arith.constant 256 : index
    %302 = vector.load %arg9[%301, %c256_142] : memref<64x512xf32, #tpu.memory_space<vmem>>, vector<8x128xf32>
    %c0_143 = arith.constant 0 : index
    %c256_144 = arith.constant 256 : index
    %303 = vector.load %arg4[%c0_143, %c256_144] : memref<128x512xbf16, #tpu.memory_space<vmem>>, vector<128x128xbf16>
    %cst_145 = arith.constant dense<0.000000e+00> : vector<8x128xf32>
    %304 = tpu.matmul %277, %303, %cst_145 {dimension_numbers = #tpu.dot_dimension_numbers<[1], [0], [0], [1], [0, 0, 1, 1], [], []>} : vector<8x128xbf16>, vector<128x128xbf16>, vector<8x128xf32> -> vector<8x128xf32>
    %305 = arith.addf %302, %304 : vector<8x128xf32>
    %306 = math.tanh %305 : vector<8x128xf32>
    %307 = arith.mulf %289, %306 : vector<8x128xf32>
    %308 = arith.addf %300, %307 : vector<8x128xf32>
    %309 = arith.index_cast %279 : i32 to index
    %c384_146 = arith.constant 384 : index
    %310 = vector.load %arg9[%309, %c384_146] : memref<64x512xf32, #tpu.memory_space<vmem>>, vector<8x128xf32>
    %c0_147 = arith.constant 0 : index
    %c384_148 = arith.constant 384 : index
    %311 = vector.load %arg4[%c0_147, %c384_148] : memref<128x512xbf16, #tpu.memory_space<vmem>>, vector<128x128xbf16>
    %cst_149 = arith.constant dense<0.000000e+00> : vector<8x128xf32>
    %312 = tpu.matmul %277, %311, %cst_149 {dimension_numbers = #tpu.dot_dimension_numbers<[1], [0], [0], [1], [0, 0, 1, 1], [], []>} : vector<8x128xbf16>, vector<128x128xbf16>, vector<8x128xf32> -> vector<8x128xf32>
    %313 = arith.addf %310, %312 : vector<8x128xf32>
    %314 = arith.negf %313 : vector<8x128xf32>
    %315 = math.exp %314 : vector<8x128xf32>
    %cst_150 = arith.constant 1.000000e+00 : f32
    %316 = vector.broadcast %cst_150 : f32 to vector<8x128xf32>
    %317 = arith.addf %316, %315 : vector<8x128xf32>
    %318 = arith.divf %316, %317 : vector<8x128xf32>
    %319 = math.tanh %308 : vector<8x128xf32>
    %320 = arith.mulf %318, %319 : vector<8x128xf32>
    %c7_i32 = arith.constant 7 : i32
    %321 = arith.truncf %320 : vector<8x128xf32> to vector<8x128xbf16>
    %c8_i32_151 = arith.constant 8 : i32
    %322 = arith.muli %c7_i32, %c8_i32_151 : i32
    %323 = tpu.assume_multiple %322, 8 : i32
    %324 = arith.index_cast %323 : i32 to index
    %c0_152 = arith.constant 0 : index
    %325 = vector.load %arg9[%324, %c0_152] : memref<64x512xf32, #tpu.memory_space<vmem>>, vector<8x128xf32>
    %c0_153 = arith.constant 0 : index
    %c0_154 = arith.constant 0 : index
    %326 = vector.load %arg4[%c0_153, %c0_154] : memref<128x512xbf16, #tpu.memory_space<vmem>>, vector<128x128xbf16>
    %cst_155 = arith.constant dense<0.000000e+00> : vector<8x128xf32>
    %327 = tpu.matmul %321, %326, %cst_155 {dimension_numbers = #tpu.dot_dimension_numbers<[1], [0], [0], [1], [0, 0, 1, 1], [], []>} : vector<8x128xbf16>, vector<128x128xbf16>, vector<8x128xf32> -> vector<8x128xf32>
    %328 = arith.addf %325, %327 : vector<8x128xf32>
    %329 = arith.negf %328 : vector<8x128xf32>
    %330 = math.exp %329 : vector<8x128xf32>
    %cst_156 = arith.constant 1.000000e+00 : f32
    %331 = vector.broadcast %cst_156 : f32 to vector<8x128xf32>
    %332 = arith.addf %331, %330 : vector<8x128xf32>
    %333 = arith.divf %331, %332 : vector<8x128xf32>
    %334 = arith.index_cast %323 : i32 to index
    %c128_157 = arith.constant 128 : index
    %335 = vector.load %arg9[%334, %c128_157] : memref<64x512xf32, #tpu.memory_space<vmem>>, vector<8x128xf32>
    %c0_158 = arith.constant 0 : index
    %c128_159 = arith.constant 128 : index
    %336 = vector.load %arg4[%c0_158, %c128_159] : memref<128x512xbf16, #tpu.memory_space<vmem>>, vector<128x128xbf16>
    %cst_160 = arith.constant dense<0.000000e+00> : vector<8x128xf32>
    %337 = tpu.matmul %321, %336, %cst_160 {dimension_numbers = #tpu.dot_dimension_numbers<[1], [0], [0], [1], [0, 0, 1, 1], [], []>} : vector<8x128xbf16>, vector<128x128xbf16>, vector<8x128xf32> -> vector<8x128xf32>
    %338 = arith.addf %335, %337 : vector<8x128xf32>
    %339 = arith.negf %338 : vector<8x128xf32>
    %340 = math.exp %339 : vector<8x128xf32>
    %cst_161 = arith.constant 1.000000e+00 : f32
    %341 = vector.broadcast %cst_161 : f32 to vector<8x128xf32>
    %342 = arith.addf %341, %340 : vector<8x128xf32>
    %343 = arith.divf %341, %342 : vector<8x128xf32>
    %344 = arith.mulf %343, %308 : vector<8x128xf32>
    %345 = arith.index_cast %323 : i32 to index
    %c256_162 = arith.constant 256 : index
    %346 = vector.load %arg9[%345, %c256_162] : memref<64x512xf32, #tpu.memory_space<vmem>>, vector<8x128xf32>
    %c0_163 = arith.constant 0 : index
    %c256_164 = arith.constant 256 : index
    %347 = vector.load %arg4[%c0_163, %c256_164] : memref<128x512xbf16, #tpu.memory_space<vmem>>, vector<128x128xbf16>
    %cst_165 = arith.constant dense<0.000000e+00> : vector<8x128xf32>
    %348 = tpu.matmul %321, %347, %cst_165 {dimension_numbers = #tpu.dot_dimension_numbers<[1], [0], [0], [1], [0, 0, 1, 1], [], []>} : vector<8x128xbf16>, vector<128x128xbf16>, vector<8x128xf32> -> vector<8x128xf32>
    %349 = arith.addf %346, %348 : vector<8x128xf32>
    %350 = math.tanh %349 : vector<8x128xf32>
    %351 = arith.mulf %333, %350 : vector<8x128xf32>
    %352 = arith.addf %344, %351 : vector<8x128xf32>
    %353 = arith.index_cast %323 : i32 to index
    %c384_166 = arith.constant 384 : index
    %354 = vector.load %arg9[%353, %c384_166] : memref<64x512xf32, #tpu.memory_space<vmem>>, vector<8x128xf32>
    %c0_167 = arith.constant 0 : index
    %c384_168 = arith.constant 384 : index
    %355 = vector.load %arg4[%c0_167, %c384_168] : memref<128x512xbf16, #tpu.memory_space<vmem>>, vector<128x128xbf16>
    %cst_169 = arith.constant dense<0.000000e+00> : vector<8x128xf32>
    %356 = tpu.matmul %321, %355, %cst_169 {dimension_numbers = #tpu.dot_dimension_numbers<[1], [0], [0], [1], [0, 0, 1, 1], [], []>} : vector<8x128xbf16>, vector<128x128xbf16>, vector<8x128xf32> -> vector<8x128xf32>
    %357 = arith.addf %354, %356 : vector<8x128xf32>
    %358 = arith.negf %357 : vector<8x128xf32>
    %359 = math.exp %358 : vector<8x128xf32>
    %cst_170 = arith.constant 1.000000e+00 : f32
    %360 = vector.broadcast %cst_170 : f32 to vector<8x128xf32>
    %361 = arith.addf %360, %359 : vector<8x128xf32>
    %362 = arith.divf %360, %361 : vector<8x128xf32>
    %363 = math.tanh %352 : vector<8x128xf32>
    %364 = arith.mulf %362, %363 : vector<8x128xf32>
    %c8_i32_171 = arith.constant 8 : i32
    %c0_172 = arith.constant 0 : index
    %c0_173 = arith.constant 0 : index
    %365 = vector.load %arg7[%c0_172, %c0_173] : memref<8x128xf32, #tpu.memory_space<vmem>>, vector<8x128xf32>
    tpu.vector_store %arg7[%c0_172, %c0_173], %364 {strides = array<i32>} : memref<8x128xf32, #tpu.memory_space<vmem>>, vector<8x128xf32>,
    %c0_174 = arith.constant 0 : index
    %c0_175 = arith.constant 0 : index
    %366 = vector.load %arg8[%c0_174, %c0_175] : memref<8x128xf32, #tpu.memory_space<vmem>>, vector<8x128xf32>
    tpu.vector_store %arg8[%c0_174, %c0_175], %352 {strides = array<i32>} : memref<8x128xf32, #tpu.memory_space<vmem>>, vector<8x128xf32>,
    %c0_i32_176 = arith.constant 0 : i32
    %367 = arith.cmpi eq, %arg1, %c0_i32_176 : i32
    %368 = arith.extui %367 : i1 to i32
    %c0_i32_177 = arith.constant 0 : i32
    %369 = arith.cmpi ne, %368, %c0_i32_177 : i32
    scf.if %369 {
      %c0_178 = arith.constant 0 : index
      %c0_179 = arith.constant 0 : index
      %370 = vector.load %arg6[%c0_178, %c0_179] : memref<8x128xf32, #tpu.memory_space<vmem>>, vector<8x128xf32>
      tpu.vector_store %arg6[%c0_178, %c0_179], %364 {strides = array<i32>} : memref<8x128xf32, #tpu.memory_space<vmem>>, vector<8x128xf32>,
    } else {
    }
    return
  }
  func.func @transform_0(%arg0: i32, %arg1: i32) -> (i32, i32, i32, i32) {
    %c0_i32 = arith.constant 0 : i32
    %c0_i32_0 = arith.constant 0 : i32
    %c0_i32_1 = arith.constant 0 : i32
    return %arg0, %arg1, %c0_i32, %c0_i32_0 : i32, i32, i32, i32
  }
  func.func @transform_1(%arg0: i32, %arg1: i32) -> (i32, i32) {
    %c0_i32 = arith.constant 0 : i32
    %c0_i32_0 = arith.constant 0 : i32
    %c0_i32_1 = arith.constant 0 : i32
    return %c0_i32, %c0_i32_0 : i32, i32
  }
  func.func @transform_2(%arg0: i32, %arg1: i32) -> (i32, i32) {
    %c0_i32 = arith.constant 0 : i32
    %c0_i32_0 = arith.constant 0 : i32
    %c0_i32_1 = arith.constant 0 : i32
    return %c0_i32, %c0_i32_0 : i32, i32
  }
  func.func @transform_3(%arg0: i32, %arg1: i32) -> (i32, i32) {
    %c0_i32 = arith.constant 0 : i32
    %c0_i32_0 = arith.constant 0 : i32
    %c0_i32_1 = arith.constant 0 : i32
    return %c0_i32, %c0_i32_0 : i32, i32
  }
  func.func @transform_4(%arg0: i32, %arg1: i32) -> (i32, i32) {
    %c0_i32 = arith.constant 0 : i32
    %c0_i32_0 = arith.constant 0 : i32
    return %arg0, %c0_i32 : i32, i32
  }
}

</mosaic_0001>

<bundles_post_ra>
// kernel: tpu_custom_call.1
= control target key start
LH: loop header
LB: loop body
LE: loop exit
PB: predicated region body
PF: predicated region fallthrough
CT: control target
= control target key end

     0   :  { %9 = vsyncpa [#allocation6], 0  ;;  %s2542_s0 = inlined_call_operand.vmem [shape: bf16[1,1,64,16], index: 0, kind: input, shape index: {}]   ;;  %s2543_s1 = inlined_call_operand.vmem [shape: bf16[16,512], index: 1, kind: input, shape index: {}]   ;;  %s2544_s2 = inlined_call_operand.hbm [shape: bf16[128,512], index: 2, kind: input, shape index: {}]   ;;  %s2545_s3 = inlined_call_operand.vmem [shape: f32[1,512], index: 3, kind: input, shape index: {}]   ;;  %s2546_s4 = inlined_call_operand.hbm [shape: f32[8,128], index: 4, kind: output, shape index: {}]  }
   0x1   :  { %10 = vsyncpa [#allocation7], 0  ;;  %s19_s17 = sshll.u32 %s2544_s2, 4  ;;  %s1993_s18 = smov [#allocation5]   ;;  %s20_s17 = int_to_ptr.hbm [resolvable:$true] %s19_s17 }
   0x2   :  { %s21_s19 = sshll.u32 %s1993_s18, 4  ;;  %s1994_s20 = smov 256   ;;  %s22_s19 = int_to_ptr.vmem [resolvable:$true] %s21_s19 }
   0x3   :  { %s1995_s21 = smov 16  }
   0x4   :  { %27 = dma.hbm_to_vmem [thread:$0]  %s20_s17, 4096, %s22_s19, [#allocation6], %s1994_s20, %s1994_s20, %s1995_s21  }
   0x5   :  { %1989 = dma.done.wait [#allocation6], 4096  }
   0x6   :  { %1990 = vsyncadd [#allocation6], 4294963200  ;;  %v1586_v0 = vld [vmem:[%s2543_s1] sm:$0xf]  ;;  %v1774_v1 = vld [vmem:[%s2543_s1 + $0xc] sm:$0xf0] }
   0x7   :  { %v1772_v2 = vld [vmem:[%s2543_s1 + $0x4] sm:$0xf]  ;;  %v1587_v3 = vor.u32 %v1774_v1, %v1586_v0  ;;  %v1588_v4 = vld [vmem:[%s2543_s1 + $0x10] sm:$0xf0]  ;;  %v1594_v5 = vld [vmem:[%s2543_s1 + $0x8] sm:$0xf] }
   0x8   :  { %v1775_v6 = vld [vmem:[%s2543_s1 + $0x14] sm:$0xf0]  ;;  %v1591_v7 = vor.u32 %v1772_v2, %v1588_v4  ;;  %v1773_v9 = vld [vmem:[%s2543_s1 + $0xc] sm:$0xf]  ;;  %v1596_v10 = vld [vmem:[%s2543_s1 + $0x18] sm:$0xf0] }
   0x9   :  { %v1595_v8 = vor.u32 %v1775_v6, %v1594_v5  ;;  %v1768_v11 = vld [vmem:[%s2542_s0] sm:$0xff]  ;;  %vm103_vm0 = vcmask 130048   ;;  %123 = vmatpush.bf16.msra.mxu0 %v1587_v3  ;;  %v1599_v12 = vor.u32 %v1773_v9, %v1596_v10  ;;  %v1783_v14 = vld [vmem:[#allocation5 + $0xec] sm:$0xf0]  ;;  %v1791_v17 = vld [vmem:[#allocation5 + $0xf0] sm:$0xf0] }
   0xa   :  { %v1646_v13 = vld [vmem:[#allocation5 + $0xe0] sm:$0xf]  ;;  %v1679_v15 = vld [vmem:[#allocation5 + $0xe4] sm:$0xf]  ;;  %152 = vmatpush.bf16.msra.mxu1 %v1591_v7  ;;  %v1744_v18 = vld [vmem:[#allocation5 + $0xec] sm:$0xf] }
   0xb   :  { %181 = vmatpush.bf16.msra.mxu2 %v1595_v8  ;;  %v2053_v16 = vor.u32 %v1783_v14, %v1646_v13  ;;  %v1807_v19 = vld [vmem:[#allocation5 + $0xf8] sm:$0xf0]  ;;  %210 = vmatpush.bf16.msra.mxu3 %v1599_v12  ;;  %v2055_v20 = vor.u32 %v1791_v17, %v1679_v15  ;;  %v1642_v22 = vld [vmem:[#allocation5 + $0xc0] sm:$0xf]  ;;  %v1782_v23 = vld [vmem:[#allocation5 + $0xcc] sm:$0xf0] }
   0xc   :  { %v2057_v21 = vor.u32 %v1807_v19, %v1744_v18  ;;  %v1675_v24 = vld [vmem:[#allocation5 + $0xc4] sm:$0xf]  ;;  %1600 = vmatmul.msk.bf16.vlgmr.msra.gmra.mxu0 %vm103_vm0, %v1768_v11  ;;  %v1790_v25 = vld [vmem:[#allocation5 + $0xd0] sm:$0xf0]  ;;  %v1740_v26 = vld [vmem:[#allocation5 + $0xcc] sm:$0xf]  ;;  %v2064_v30 = vor.u32 %v1782_v23, %v1642_v22 }
   0xd   :  { %v1806_v27 = vld [vmem:[#allocation5 + $0xd8] sm:$0xf0]  ;;  %1604 = vmatmul.msk.bf16.vlgmr.msra.gmra.mxu1 %vm103_vm0, %v1768_v11  ;;  %v1712_v28 = vld [vmem:[#allocation5 + $0xe8] sm:$0xf]  ;;  %v1799_v29 = vld [vmem:[#allocation5 + $0xf4] sm:$0xf0]  ;;  %335 = vmatpush.bf16.msrb.mxu0 %v2053_v16  ;;  %v2070_v34 = vor.u32 %v1790_v25, %v1675_v24 }
   0xe   :  { %1608 = vmatmul.msk.bf16.vlgmr.msra.gmra.mxu2 %vm103_vm0, %v1768_v11  ;;  %1612 = vmatmul.msk.bf16.vlgmr.msra.gmra.mxu3 %vm103_vm0, %v1768_v11  ;;  %v2066_v31 = vor.u32 %v1799_v29, %v1712_v28  ;;  %v1638_v32 = vld [vmem:[#allocation5 + $0xa0] sm:$0xf]  ;;  %v1781_v33 = vld [vmem:[#allocation5 + $0xac] sm:$0xf0]  ;;  %v2072_v35 = vor.u32 %v1806_v27, %v1740_v26  ;;  %v1671_v36 = vld [vmem:[#allocation5 + $0xa4] sm:$0xf] }
   0xf   :  { %433 = vmatpush.bf16.msrb.mxu1 %v2055_v20  ;;  %614 = vmatpush.bf16.msrb.mxu3 %v2057_v21  ;;  %v1789_v37 = vld [vmem:[#allocation5 + $0xb0] sm:$0xf0]  ;;  %v1736_v38 = vld [vmem:[#allocation5 + $0xac] sm:$0xf]  ;;  %v1805_v39 = vld [vmem:[#allocation5 + $0xb8] sm:$0xf0]  ;;  %v2078_v43 = vor.u32 %v1781_v33, %v1638_v32 }
  0x10   :  { %532 = vmatpush.bf16.msrb.mxu2 %v2066_v31  ;;  %v1708_v40 = vld [vmem:[#allocation5 + $0xc8] sm:$0xf]  ;;  %v1798_v41 = vld [vmem:[#allocation5 + $0xd4] sm:$0xf0]  ;;  %v1634_v44 = vld [vmem:[#allocation5 + $0x80] sm:$0xf]  ;;  %v2082_v46 = vor.u32 %v1789_v37, %v1671_v36  ;;  %v2084_v47 = vor.u32 %v1805_v39, %v1736_v38 }
  0x11   :  { %v2075_v42 = vor.u32 %v1798_v41, %v1708_v40  ;;  %336 = vmatpush.bf16.msrb.mxu0 %v2064_v30  ;;  %v1704_v45 = vld [vmem:[#allocation5 + $0xa8] sm:$0xf]  ;;  %v1780_v48 = vld [vmem:[#allocation5 + $0x8c] sm:$0xf0]  ;;  %v1667_v49 = vld [vmem:[#allocation5 + $0x84] sm:$0xf] }
  0x12   :  { %v1797_v50 = vld [vmem:[#allocation5 + $0xb4] sm:$0xf0]  ;;  %v1788_v51 = vld [vmem:[#allocation5 + $0x90] sm:$0xf0]  ;;  %v1732_v52 = vld [vmem:[#allocation5 + $0x8c] sm:$0xf]  ;;  %v2093_v57 = vor.u32 %v1780_v48, %v1634_v44 }
  0x13   :  { %434 = vmatpush.bf16.msrb.mxu1 %v2070_v34  ;;  %615 = vmatpush.bf16.msrb.mxu3 %v2072_v35  ;;  %v1804_v53 = vld [vmem:[#allocation5 + $0x98] sm:$0xf0]  ;;  %v2087_v54 = vor.u32 %v1797_v50, %v1704_v45  ;;  %v1700_v55 = vld [vmem:[#allocation5 + $0x88] sm:$0xf]  ;;  %v1796_v58 = vld [vmem:[#allocation5 + $0x94] sm:$0xf0]  ;;  %v2097_v59 = vor.u32 %v1788_v51, %v1667_v49 }
  0x14   :  { %533 = vmatpush.bf16.msrb.mxu2 %v2075_v42  ;;  %v1769_v56 = vld [vmem:[%s2542_s0 + $0x8] sm:$0xff]  ;;  %v2099_v60 = vor.u32 %v1804_v53, %v1732_v52  ;;  %v1630_v61 = vld [vmem:[#allocation5 + $0x60] sm:$0xf]  ;;  %v1779_v62 = vld [vmem:[#allocation5 + $0x6c] sm:$0xf0]  ;;  %v2102_v3 = vor.u32 %v1796_v58, %v1700_v55  ;;  %s1551_s22 = sshll.u32 %s2546_s4, 4  ;;  %s1552_s22 = int_to_ptr.hbm [resolvable:$true] %s1551_s22 }
  0x15   :  { %337 = vmatpush.bf16.msrb.mxu0 %v2078_v43  ;;  %v1663_v63 = vld [vmem:[#allocation5 + $0x64] sm:$0xf]  ;;  %v1787_v0 = vld [vmem:[#allocation5 + $0x70] sm:$0xf0]  ;;  %v1728_v1 = vld [vmem:[#allocation5 + $0x6c] sm:$0xf]  ;;  %v2105_v6 = vor.u32 %v1779_v62, %v1630_v61 }
  0x16   :  { %v1803_v2 = vld [vmem:[#allocation5 + $0x78] sm:$0xf0]  ;;  %v1696_v4 = vld [vmem:[#allocation5 + $0x68] sm:$0xf]  ;;  %v1795_v5 = vld [vmem:[#allocation5 + $0x74] sm:$0xf0]  ;;  %v2109_v7 = vor.u32 %v1787_v0, %v1663_v63 }
  0x17   :  { %435 = vmatpush.bf16.msrb.mxu1 %v2082_v46  ;;  %616 = vmatpush.bf16.msrb.mxu3 %v2084_v47  ;;  %v2111_v8 = vor.u32 %v1803_v2, %v1728_v1  ;;  %v1626_v9 = vld [vmem:[#allocation5 + $0x40] sm:$0xf]  ;;  %v1778_v10 = vld [vmem:[#allocation5 + $0x4c] sm:$0xf0]  ;;  %v1659_v11 = vld [vmem:[#allocation5 + $0x44] sm:$0xf]  ;;  %v2115_v15 = vor.u32 %v1795_v5, %v1696_v4 }
  0x18   :  { %534 = vmatpush.bf16.msrb.mxu2 %v2087_v54  ;;  %v1786_v12 = vld [vmem:[#allocation5 + $0x50] sm:$0xf0]  ;;  %v1724_v13 = vld [vmem:[#allocation5 + $0x4c] sm:$0xf]  ;;  %v1802_v14 = vld [vmem:[#allocation5 + $0x58] sm:$0xf0]  ;;  %v2121_v17 = vor.u32 %v1778_v10, %v1626_v9 }
  0x19   :  { %338 = vmatpush.bf16.msrb.mxu0 %v2093_v57  ;;  %v1622_v18 = vld [vmem:[#allocation5 + $0x20] sm:$0xf]  ;;  %v1777_v19 = vld [vmem:[#allocation5 + $0x2c] sm:$0xf0]  ;;  %v2125_v22 = vor.u32 %v1786_v12, %v1659_v11  ;;  %v2127_v23 = vor.u32 %v1802_v14, %v1724_v13  ;;  %v1655_v24 = vld [vmem:[#allocation5 + $0x24] sm:$0xf] }
  0x1a   :  { %v1692_v25 = vld [vmem:[#allocation5 + $0x48] sm:$0xf]  ;;  %v1794_v26 = vld [vmem:[#allocation5 + $0x54] sm:$0xf0]  ;;  %v1785_v27 = vld [vmem:[#allocation5 + $0x30] sm:$0xf0]  ;;  %v2133_v33 = vor.u32 %v1777_v19, %v1622_v18 }
  0x1b   :  { %436 = vmatpush.bf16.msrb.mxu1 %v2097_v59  ;;  %617 = vmatpush.bf16.msrb.mxu3 %v2099_v60  ;;  %v2130_v28 = vor.u32 %v1794_v26, %v1692_v25  ;;  %v1720_v29 = vld [vmem:[#allocation5 + $0x2c] sm:$0xf]  ;;  %v1801_v32 = vld [vmem:[#allocation5 + $0x38] sm:$0xf0]  ;;  %v1688_v36 = vld [vmem:[#allocation5 + $0x28] sm:$0xf]  ;;  %v2137_v38 = vor.u32 %v1785_v27, %v1655_v24 }
  0x1c   :  { %1601 = vmatmul.msk.bf16.gmra.mxu0 %vm103_vm0, %v1769_v56  ;;  %535 = vmatpush.bf16.msrb.mxu2 %v2102_v3  ;;  %v1793_v37 = vld [vmem:[#allocation5 + $0x34] sm:$0xf0]  ;;  %v2139_v39 = vor.u32 %v1801_v32, %v1720_v29  ;;  %v1618_v40 = vld [vmem:[#allocation5] sm:$0xf]  ;;  %v1776_v41 = vld [vmem:[#allocation5 + $0xc] sm:$0xf0] }
  0x1d   :  { %1605 = vmatmul.msk.bf16.gmra.mxu1 %vm103_vm0, %v1769_v56  ;;  %339 = vmatpush.bf16.msrb.mxu0 %v2105_v6  ;;  %v1651_v44 = vld [vmem:[#allocation5 + $0x4] sm:$0xf]  ;;  %v1784_v45 = vld [vmem:[#allocation5 + $0x10] sm:$0xf0]  ;;  %v2142_v48 = vor.u32 %v1793_v37, %v1688_v36  ;;  %v1716_v49 = vld [vmem:[#allocation5 + $0xc] sm:$0xf]  ;;  %v2145_v53 = vor.u32 %v1776_v41, %v1618_v40 }
  0x1e   :  { %1609 = vmatmul.msk.bf16.gmra.mxu2 %vm103_vm0, %v1769_v56  ;;  %1613 = vmatmul.msk.bf16.gmra.mxu3 %vm103_vm0, %v1769_v56  ;;  %v1800_v50 = vld [vmem:[#allocation5 + $0x18] sm:$0xf0]  ;;  %v1684_v51 = vld [vmem:[#allocation5 + $0x8] sm:$0xf]  ;;  %v1792_v52 = vld [vmem:[#allocation5 + $0x14] sm:$0xf0]  ;;  %v2149_v55 = vor.u32 %v1784_v45, %v1651_v44 }
  0x1f   :  { %437 = vmatpush.bf16.msrb.mxu1 %v2109_v7  ;;  %618 = vmatpush.bf16.msrb.mxu3 %v2111_v8  ;;  %v2151_v56 = vor.u32 %v1800_v50, %v1716_v49  ;;  %v1770_v58 = vld [vmem:[%s2542_s0 + $0x10] sm:$0xff]  ;;  %v2157_v61 = vor.u32 %v1792_v52, %v1684_v51  ;;  %v1771_v62 = vld [vmem:[%s2542_s0 + $0x18] sm:$0xff]  ;;  %v1996_v63 = vmov 0.0|0.0   ;;  %v53_v2 = vld [vmem:[%s2545_s3] sm:$0xf]  ;;  %s1997_s3 = smov [#allocation8]  }
  0x20   :  { %536 = vmatpush.bf16.msrb.mxu2 %v2115_v15  ;;  %v55_v4 = vperm.slane %v53_v2, 0  ;;  %v56_v9 = vperm.slane %v53_v2, 1  ;;  %v2249_v18 = vperm.slane %v53_v2, 2  ;;  %v2251_v19 = vperm.slane %v53_v2, 3  ;;  %s1549_s19 = sshll.u32 %s1997_s3, 4  ;;  %s1550_s19 = int_to_ptr.vmem [resolvable:$true] %s1549_s19 }
  0x21   :  { %340 = vmatpush.bf16.msrb.mxu0 %v2121_v17 }
  0x23   :  { %438 = vmatpush.bf16.msrb.mxu1 %v2125_v22  ;;  %619 = vmatpush.bf16.msrb.mxu3 %v2127_v23 }
  0x24   :  { %537 = vmatpush.bf16.msrb.mxu2 %v2130_v28 }
  0x25   :  { %341 = vmatpush.bf16.msrb.mxu0 %v2133_v33 }
  0x27   :  { %439 = vmatpush.bf16.msrb.mxu1 %v2137_v38  ;;  %620 = vmatpush.bf16.msrb.mxu3 %v2139_v39 }
  0x28   :  { %538 = vmatpush.bf16.msrb.mxu2 %v2142_v48 }
  0x29   :  { %342 = vmatpush.bf16.msrb.mxu0 %v2145_v53 }
  0x2b   :  { %440 = vmatpush.bf16.msrb.mxu1 %v2149_v55  ;;  %621 = vmatpush.bf16.msrb.mxu3 %v2151_v56 }
  0x2c   :  { %1602 = vmatmul.msk.bf16.gmra.mxu0 %vm103_vm0, %v1770_v58  ;;  %539 = vmatpush.bf16.msrb.mxu2 %v2157_v61 }
  0x2d   :  { %1606 = vmatmul.msk.bf16.gmra.mxu1 %vm103_vm0, %v1770_v58  ;;  %654 = vmatpush.bf16.msra.mxu0 %v2053_v16 }
  0x2e   :  { %1610 = vmatmul.msk.bf16.gmra.mxu2 %vm103_vm0, %v1770_v58  ;;  %1614 = vmatmul.msk.bf16.gmra.mxu3 %vm103_vm0, %v1770_v58 }
  0x2f   :  { %688 = vmatpush.bf16.msra.mxu1 %v2055_v20  ;;  %741 = vmatpush.bf16.msra.mxu3 %v2057_v21 }
  0x30   :  { %723 = vmatpush.bf16.msra.mxu2 %v2066_v31 }
  0x31   :  { %655 = vmatpush.bf16.msra.mxu0 %v2064_v30 }
  0x33   :  { %689 = vmatpush.bf16.msra.mxu1 %v2070_v34  ;;  %742 = vmatpush.bf16.msra.mxu3 %v2072_v35 }
  0x34   :  { %724 = vmatpush.bf16.msra.mxu2 %v2075_v42 }
  0x35   :  { %656 = vmatpush.bf16.msra.mxu0 %v2078_v43 }
  0x37   :  { %690 = vmatpush.bf16.msra.mxu1 %v2082_v46  ;;  %743 = vmatpush.bf16.msra.mxu3 %v2084_v47 }
  0x38   :  { %725 = vmatpush.bf16.msra.mxu2 %v2087_v54 }
  0x39   :  { %657 = vmatpush.bf16.msra.mxu0 %v2093_v57 }
  0x3b   :  { %691 = vmatpush.bf16.msra.mxu1 %v2097_v59  ;;  %744 = vmatpush.bf16.msra.mxu3 %v2099_v60 }
  0x3c   :  { %726 = vmatpush.bf16.msra.mxu2 %v2102_v3  ;;  %1603 = vmatmul.msk.bf16.gmra.mxu0 %vm103_vm0, %v1771_v62 }
  0x3d   :  { %1607 = vmatmul.msk.bf16.gmra.mxu1 %vm103_vm0, %v1771_v62  ;;  %658 = vmatpush.bf16.msra.mxu0 %v2105_v6 }
  0x3e   :  { %1611 = vmatmul.msk.bf16.gmra.mxu2 %vm103_vm0, %v1771_v62  ;;  %1615 = vmatmul.msk.bf16.gmra.mxu3 %vm103_vm0, %v1771_v62 }
  0x3f   :  { %692 = vmatpush.bf16.msra.mxu1 %v2109_v7  ;;  %745 = vmatpush.bf16.msra.mxu3 %v2111_v8 }
  0x40   :  { %727 = vmatpush.bf16.msra.mxu2 %v2115_v15 }
  0x41   :  { %659 = vmatpush.bf16.msra.mxu0 %v2121_v17 }
  0x43   :  { %693 = vmatpush.bf16.msra.mxu1 %v2125_v22  ;;  %746 = vmatpush.bf16.msra.mxu3 %v2127_v23 }
  0x44   :  { %728 = vmatpush.bf16.msra.mxu2 %v2130_v28 }
  0x45   :  { %660 = vmatpush.bf16.msra.mxu0 %v2133_v33 }
  0x47   :  { %694 = vmatpush.bf16.msra.mxu1 %v2137_v38  ;;  %747 = vmatpush.bf16.msra.mxu3 %v2139_v39 }
  0x48   :  { %729 = vmatpush.bf16.msra.mxu2 %v2142_v48 }
  0x49   :  { %661 = vmatpush.bf16.msra.mxu0 %v2145_v53 }
  0x4b   :  { %695 = vmatpush.bf16.msra.mxu1 %v2149_v55  ;;  %748 = vmatpush.bf16.msra.mxu3 %v2151_v56 }
  0x4c   :  { %730 = vmatpush.bf16.msra.mxu2 %v2157_v61  ;;  %343 = vmatmul.bf16.vlgmr.msrb.gmra.mxu0 %v1996_v63 }
  0x4d   :  { %441 = vmatmul.bf16.vlgmr.msrb.gmra.mxu1 %v1996_v63  ;;  %781 = vmatpush.bf16.msrb.mxu0 %v2053_v16 }
  0x4e   :  { %540 = vmatmul.bf16.vlgmr.msrb.gmra.mxu2 %v1996_v63  ;;  %622 = vmatmul.bf16.vlgmr.msrb.gmra.mxu3 %v1996_v63 }
  0x4f   :  { %815 = vmatpush.bf16.msrb.mxu1 %v2055_v20  ;;  %868 = vmatpush.bf16.msrb.mxu3 %v2057_v21 }
  0x50   :  { %850 = vmatpush.bf16.msrb.mxu2 %v2066_v31 }
  0x51   :  { %782 = vmatpush.bf16.msrb.mxu0 %v2064_v30 }
  0x53   :  { %816 = vmatpush.bf16.msrb.mxu1 %v2070_v34  ;;  %869 = vmatpush.bf16.msrb.mxu3 %v2072_v35 }
  0x54   :  { %851 = vmatpush.bf16.msrb.mxu2 %v2075_v42 }
  0x55   :  { %783 = vmatpush.bf16.msrb.mxu0 %v2078_v43 }
  0x57   :  { %817 = vmatpush.bf16.msrb.mxu1 %v2082_v46  ;;  %870 = vmatpush.bf16.msrb.mxu3 %v2084_v47 }
  0x58   :  { %852 = vmatpush.bf16.msrb.mxu2 %v2087_v54 }
  0x59   :  { %784 = vmatpush.bf16.msrb.mxu0 %v2093_v57 }
  0x5b   :  { %818 = vmatpush.bf16.msrb.mxu1 %v2097_v59  ;;  %871 = vmatpush.bf16.msrb.mxu3 %v2099_v60 }
  0x5c   :  { %853 = vmatpush.bf16.msrb.mxu2 %v2102_v3 }
  0x5d   :  { %785 = vmatpush.bf16.msrb.mxu0 %v2105_v6 }
  0x5f   :  { %819 = vmatpush.bf16.msrb.mxu1 %v2109_v7  ;;  %872 = vmatpush.bf16.msrb.mxu3 %v2111_v8 }
  0x60   :  { %854 = vmatpush.bf16.msrb.mxu2 %v2115_v15 }
  0x61   :  { %786 = vmatpush.bf16.msrb.mxu0 %v2121_v17 }
  0x63   :  { %820 = vmatpush.bf16.msrb.mxu1 %v2125_v22  ;;  %873 = vmatpush.bf16.msrb.mxu3 %v2127_v23 }
  0x64   :  { %855 = vmatpush.bf16.msrb.mxu2 %v2130_v28 }
  0x65   :  { %787 = vmatpush.bf16.msrb.mxu0 %v2133_v33 }
  0x67   :  { %821 = vmatpush.bf16.msrb.mxu1 %v2137_v38  ;;  %874 = vmatpush.bf16.msrb.mxu3 %v2139_v39 }
  0x68   :  { %856 = vmatpush.bf16.msrb.mxu2 %v2142_v48 }
  0x69   :  { %788 = vmatpush.bf16.msrb.mxu0 %v2145_v53 }
  0x6b   :  { %822 = vmatpush.bf16.msrb.mxu1 %v2149_v55  ;;  %875 = vmatpush.bf16.msrb.mxu3 %v2151_v56 }
  0x6c   :  { %857 = vmatpush.bf16.msrb.mxu2 %v2157_v61 }
  0x89   :  { %v125_v0 = vpop.f32.mrf.mxu0 }
  0x8a   :  { %v154_v1 = vpop.f32.mrf.mxu1 }
  0x91   :  { %v2241_v5 = vpop.f32.mrf.mxu2  ;;  %v2243_v10 = vpop.f32.mrf.mxu3 }
  0x92   :  { %v127_v11 = vpop.f32.mrf.mxu0  ;;  %v156_v13 = vpop.f32.mrf.mxu1 }
  0x93   :  { %v2245_v12 = vadd.f32 %v127_v11, %v55_v4  ;;  %v2247_v14 = vadd.f32 %v156_v13, %v56_v9 }
  0x99   :  { %v185_v24 = vpop.f32.mrf.mxu2  ;;  %v214_v26 = vpop.f32.mrf.mxu3 }
  0x9a   :  { %v2254_v25 = vadd.f32 %v185_v24, %v2249_v18  ;;  %v130_v27 = vpop.f32.mrf.mxu0  ;;  %v2257_v29 = vadd.f32 %v214_v26, %v2251_v19  ;;  %v159_v36 = vpop.f32.mrf.mxu1 }
  0x9b   :  { %v2259_v32 = vadd.f32 %v130_v27, %v55_v4  ;;  %v2261_v37 = vadd.f32 %v159_v36, %v56_v9 }
  0xa1   :  { %v188_v40 = vpop.f32.mrf.mxu2  ;;  %v217_v44 = vpop.f32.mrf.mxu3 }
  0xa2   :  { %v2264_v41 = vadd.f32 %v188_v40, %v2249_v18  ;;  %v132_v45 = vpop.f32.mrf.mxu0  ;;  %v2267_v49 = vadd.f32 %v217_v44, %v2251_v19  ;;  %v161_v51 = vpop.f32.mrf.mxu1 }
  0xa3   :  { %v2269_v50 = vadd.f32 %v132_v45, %v55_v4  ;;  %v2271_v52 = vadd.f32 %v161_v51, %v56_v9 }
  0xa4   :  { %2547 = vst [vmem:[#allocation11_spill] sm:$0xff] %v2264_v41 }
  0xa5   :  { %2548 = vst [vmem:[#allocation12_spill] sm:$0xff] %v2269_v50 }
  0xa6   :  { %2549 = vst [vmem:[#allocation13_spill] sm:$0xff] %v2271_v52 }
  0xa9   :  { %v190_v58 = vpop.f32.mrf.mxu2  ;;  %v219_v63 = vpop.f32.mrf.mxu3 }
  0xaa   :  { %v2274_v62 = vadd.f32 %v190_v58, %v2249_v18  ;;  %v135_v2 = vpop.f32.mrf.mxu0  ;;  %v2277_v11 = vadd.f32 %v219_v63, %v2251_v19  ;;  %v164_v24 = vpop.f32.mrf.mxu1 }
  0xab   :  { %v2279_v13 = vadd.f32 %v135_v2, %v55_v4  ;;  %v2281_v26 = vadd.f32 %v164_v24, %v56_v9 }
  0xac   :  { %2550 = vst [vmem:[#allocation14_spill] sm:$0xff] %v2274_v62 }
  0xad   :  { %2551 = vst [vmem:[#allocation15_spill] sm:$0xff] %v2277_v11 }
  0xae   :  { %2552 = vst [vmem:[#allocation16_spill] sm:$0xff] %v2279_v13 }
  0xaf   :  { %2553 = vst [vmem:[#allocation17_spill] sm:$0xff] %v2281_v26 }
  0xb1   :  { %v193_v27 = vpop.f32.mrf.mxu2  ;;  %v222_v40 = vpop.f32.mrf.mxu3 }
  0xb2   :  { %v2284_v36 = vadd.f32 %v193_v27, %v2249_v18  ;;  %v137_v44 = vpop.f32.mrf.mxu0  ;;  %v2287_v45 = vadd.f32 %v222_v40, %v2251_v19  ;;  %v166_v58 = vpop.f32.mrf.mxu1 }
  0xb3   :  { %v2289_v51 = vadd.f32 %v137_v44, %v55_v4  ;;  %v2291_v62 = vadd.f32 %v166_v58, %v56_v9 }
  0xb4   :  { %2554 = vst [vmem:[#allocation18_spill] sm:$0xff] %v2284_v36 }
  0xb5   :  { %2555 = vst [vmem:[#allocation19_spill] sm:$0xff] %v2287_v45 }
  0xb6   :  { %2556 = vst [vmem:[#allocation20_spill] sm:$0xff] %v2289_v51 }
  0xb7   :  { %2557 = vst [vmem:[#allocation21_spill] sm:$0xff] %v2291_v62 }
  0xb9   :  { %v195_v63 = vpop.f32.mrf.mxu2  ;;  %v224_v24 = vpop.f32.mrf.mxu3 }
  0xba   :  { %v2294_v2 = vadd.f32 %v195_v63, %v2249_v18  ;;  %v140_v26 = vpop.f32.mrf.mxu0  ;;  %v2297_v13 = vadd.f32 %v224_v24, %v2251_v19  ;;  %v169_v36 = vpop.f32.mrf.mxu1  ;;  %v126_v24 = vadd.f32 %v125_v0, %v55_v4  ;;  %v213_v0 = vadd.f32 %v2243_v10, %v2251_v19 }
  0xbb   :  { %v2299_v27 = vadd.f32 %v140_v26, %v55_v4  ;;  %v2301_v11 = vadd.f32 %v169_v36, %v56_v9 }
  0xbc   :  { %2558 = vst [vmem:[#allocation22_spill] sm:$0xff] %v2294_v2 }
  0xbd   :  { %2559 = vst [vmem:[#allocation23_spill] sm:$0xff] %v2297_v13 }
  0xbe   :  { %2560 = vst [vmem:[#allocation24_spill] sm:$0xff] %v2299_v27  ;;  %v155_v27 = vadd.f32 %v154_v1, %v56_v9 }
  0xbf   :  { %2561 = vst [vmem:[#allocation25_spill] sm:$0xff] %v2301_v11 }
  0xc1   :  { %v198_v40 = vpop.f32.mrf.mxu2  ;;  %v227_v58 = vpop.f32.mrf.mxu3 }
  0xc2   :  { %v2304_v44 = vadd.f32 %v198_v40, %v2249_v18  ;;  %v142_v62 = vpop.f32.mrf.mxu0  ;;  %v2307_v51 = vadd.f32 %v227_v58, %v2251_v19  ;;  %v171_v2 = vpop.f32.mrf.mxu1 }
  0xc3   :  { %v2309_v63 = vadd.f32 %v142_v62, %v55_v4  ;;  %v2311_v45 = vadd.f32 %v171_v2, %v56_v9 }
  0xc4   :  { %2562 = vst [vmem:[#allocation26_spill] sm:$0xff] %v2304_v44 }
  0xc5   :  { %2563 = vst [vmem:[#allocation27_spill] sm:$0xff] %v2307_v51 }
  0xc6   :  { %2564 = vst [vmem:[#allocation28_spill] sm:$0xff] %v2309_v63 }
  0xc7   :  { %2565 = vst [vmem:[#allocation29_spill] sm:$0xff] %v2311_v45 }
  0xc9   :  { %v200_v26 = vpop.f32.mrf.mxu2  ;;  %v229_v11 = vpop.f32.mrf.mxu3 }
  0xca   :  { %v2314_v36 = vadd.f32 %v200_v26, %v2249_v18  ;;  %v344_v13 = vpop.f32.mrf.mxu0  ;;  %v2317_v40 = vadd.f32 %v229_v11, %v2251_v19  ;;  %v442_v52 = vpop.f32.mrf.mxu1 }
  0xcb   :  { %v348_v44 = vadd.f32 %v344_v13, %v126_v24  ;;  %v446_v58 = vadd.f32 %v442_v52, %v155_v27 }
  0xcc   :  { %2566 = vst [vmem:[#allocation30_spill] sm:$0xff] %v2314_v36 }
  0xcd   :  { %2567 = vst [vmem:[#allocation31_spill] sm:$0xff] %v2317_v40  ;;  %v1648_v51 = vmul.f32 -1.442695, %v348_v44  ;;  %v1681_v62 = vmul.f32 -1.442695, %v446_v58 }
  0xcf   :  { %1813 = vpow2.f32 %v1648_v51  ;;  %v184_v51 = vadd.f32 %v2241_v5, %v2249_v18 }
  0xd0   :  { %1815 = vpow2.f32 %v1681_v62 }
  0xd1   :  { %v541_v4 = vpop.f32.mrf.mxu2  ;;  %v623_v1 = vpop.f32.mrf.mxu3 }
  0xd2   :  { %v346_v9 = vpop.f32.mrf.mxu0  ;;  %v627_v2 = vadd.f32 %v623_v1, %v213_v0  ;;  %v444_v26 = vpop.f32.mrf.mxu1  ;;  %v545_v19 = vadd.f32 %v541_v4, %v184_v51 }
  0xd4   :  { %v1746_v45 = vmul.f32 -1.442695, %v627_v2 }
  0xd5   :  { %v1814_v36 = vpop.eup %1813 }
  0xd6   :  { %v1816_v63 = vpop.eup %1815  ;;  %v352_v11 = vadd.f32 1.0, %v1814_v36  ;;  %1817 = vpow2.f32 %v1746_v45 }
  0xd7   :  { %v450_v40 = vadd.f32 1.0, %v1816_v63 }
  0xd8   :  { %1819 = vrcp.f32 %v352_v11  ;;  %v364_v36 = vand.u32 2147483648, %v352_v11  ;;  %v362_v9 = vand.u32 2147483647, %v352_v11  ;;  %vm358_vm3 = vweird.f32 %v352_v11 }
  0xd9   :  { %1821 = vrcp.f32 %v450_v40  ;;  %v543_v52 = vpop.f32.mrf.mxu2  ;;  %v625_v13 = vpop.f32.mrf.mxu3  ;;  %v462_v45 = vand.u32 2147483648, %v450_v40  ;;  %v460_v26 = vand.u32 2147483647, %v450_v40  ;;  %vm456_vm4 = vweird.f32 %v450_v40 }
  0xda   :  { %v365_v4 = vor.u32 1.1754944e-38, %v364_v36  ;;  %vm363_vm6 = vcmp.eq.f32.partialorder %v362_v9, 8.507059e+37 }
  0xdb   :  { %v463_v13 = vor.u32 1.1754944e-38, %v462_v45  ;;  %vm461_vm8 = vcmp.eq.f32.partialorder %v460_v26, 8.507059e+37 }
  0xdc   :  { %v1818_v27 = vpop.eup %1817 }
  0xdd   :  { %v631_v44 = vadd.f32 1.0, %v1818_v27 }
  0xde   :  { %v1820_v10 = vpop.eup %1819 }
  0xdf   :  { %v1822_v24 = vpop.eup %1821  ;;  %v354_v58 = vmul.f32 %v1820_v10, %v352_v11  ;;  %1823 = vrcp.f32 %v631_v44  ;;  %vm359_vm1 = vweird.f32 %v1820_v10  ;;  %v643_v36 = vand.u32 2147483648, %v631_v44 }
  0xe0   :  { %v452_v62 = vmul.f32 %v1822_v24, %v450_v40  ;;  %1825 = vtanh.f32 %v545_v19  ;;  %vm457_vm2 = vweird.f32 %v1822_v24  ;;  %vm360_vm5 = vmor %vm358_vm3, %vm359_vm1  ;;  %vm637_vm10 = vweird.f32 %v631_v44 }
  0xe1   :  { %v355_v0 = vsub.f32 1.0, %v354_v58  ;;  %vm458_vm7 = vmor %vm456_vm4, %vm457_vm2  ;;  %v644_v9 = vor.u32 1.1754944e-38, %v643_v36 }
  0xe2   :  { %v453_v1 = vsub.f32 1.0, %v452_v62 }
  0xe3   :  { %v356_v63 = vmul.f32 %v1820_v10, %v355_v0 }
  0xe4   :  { %v454_v2 = vmul.f32 %v1822_v24, %v453_v1 }
  0xe5   :  { %v357_v5 = vadd.f32 %v1820_v10, %v356_v63  ;;  %v1824_v18 = vpop.eup %1823 }
  0xe6   :  { %v455_v52 = vadd.f32 %v1822_v24, %v454_v2  ;;  %v633_v27 = vmul.f32 %v1824_v18, %v631_v44  ;;  %v1826_v19 = vpop.eup %1825  ;;  %vm638_vm9 = vweird.f32 %v1824_v18 }
  0xe7   :  { %v361_v51 = vsel %vm360_vm5, %v1820_v10, %v357_v5  ;;  %v641_v10 = vand.u32 2147483647, %v631_v44  ;;  %vm639_vm11 = vmor %vm637_vm10, %vm638_vm9 }
  0xe8   :  { %v366_v58 = vsel %vm363_vm6, %v365_v4, %v361_v51  ;;  %v459_v62 = vsel %vm458_vm7, %v1822_v24, %v455_v52  ;;  %v634_v50 = vsub.f32 1.0, %v633_v27 }
  0xe9   :  { %v464_v0 = vsel %vm461_vm8, %v463_v13, %v459_v62  ;;  %v547_v1 = vmul.f32 %v1826_v19, %v366_v58  ;;  %vm642_vm12 = vcmp.eq.f32.partialorder %v641_v10, 8.507059e+37 }
  0xea   :  { %v466_v41 = vmul.f32 0.0, %v464_v0  ;;  %v635_v63 = vmul.f32 %v1824_v18, %v634_v50 }
  0xec   :  { %v2323_v11 = vadd.f32 %v547_v1, %v466_v41  ;;  %v636_v40 = vadd.f32 %v1824_v18, %v635_v63 }
  0xee   :  { %1827 = vtanh.f32 %v2323_v11  ;;  %v640_v45 = vsel %vm639_vm11, %v1824_v18, %v636_v40 }
  0xef   :  { %v645_v2 = vsel %vm642_vm12, %v644_v9, %v640_v45 }
  0xf4   :  { %v1828_v24 = vpop.eup %1827 }
  0xf5   :  { %v648_v26 = vmul.f32 %v1828_v24, %v645_v2 }
  0xf7   :  { %v649_v5 = vpack.c.bf16 %v648_v26, %v648_v26 }
  0xf9   :  { %662 = vmatmul.bf16.vlgmr.msra.gmra.mxu0 %v649_v5  ;;  %696 = vmatmul.bf16.vlgmr.msra.gmra.mxu1 %v649_v5 }
  0xfa   :  { %731 = vmatmul.bf16.vlgmr.msra.gmra.mxu2 %v649_v5  ;;  %749 = vmatmul.bf16.vlgmr.msra.gmra.mxu3 %v649_v5 }
  0xfb   :  { %908 = vmatpush.bf16.msra.mxu0 %v2053_v16  ;;  %942 = vmatpush.bf16.msra.mxu1 %v2055_v20 }
  0xfc   :  { %977 = vmatpush.bf16.msra.mxu2 %v2066_v31  ;;  %995 = vmatpush.bf16.msra.mxu3 %v2057_v21 }
  0xff   :  { %909 = vmatpush.bf16.msra.mxu0 %v2064_v30  ;;  %943 = vmatpush.bf16.msra.mxu1 %v2070_v34 }
 0x100   :  { %978 = vmatpush.bf16.msra.mxu2 %v2075_v42  ;;  %996 = vmatpush.bf16.msra.mxu3 %v2072_v35 }
 0x103   :  { %910 = vmatpush.bf16.msra.mxu0 %v2078_v43  ;;  %944 = vmatpush.bf16.msra.mxu1 %v2082_v46 }
 0x104   :  { %979 = vmatpush.bf16.msra.mxu2 %v2087_v54  ;;  %997 = vmatpush.bf16.msra.mxu3 %v2084_v47 }
 0x107   :  { %911 = vmatpush.bf16.msra.mxu0 %v2093_v57  ;;  %945 = vmatpush.bf16.msra.mxu1 %v2097_v59 }
 0x108   :  { %980 = vmatpush.bf16.msra.mxu2 %v2102_v3  ;;  %998 = vmatpush.bf16.msra.mxu3 %v2099_v60 }
 0x10b   :  { %912 = vmatpush.bf16.msra.mxu0 %v2105_v6  ;;  %946 = vmatpush.bf16.msra.mxu1 %v2109_v7 }
 0x10c   :  { %981 = vmatpush.bf16.msra.mxu2 %v2115_v15  ;;  %999 = vmatpush.bf16.msra.mxu3 %v2111_v8 }
 0x10f   :  { %913 = vmatpush.bf16.msra.mxu0 %v2121_v17  ;;  %947 = vmatpush.bf16.msra.mxu1 %v2125_v22 }
 0x110   :  { %982 = vmatpush.bf16.msra.mxu2 %v2130_v28  ;;  %1000 = vmatpush.bf16.msra.mxu3 %v2127_v23 }
 0x113   :  { %914 = vmatpush.bf16.msra.mxu0 %v2133_v33  ;;  %948 = vmatpush.bf16.msra.mxu1 %v2137_v38 }
 0x114   :  { %983 = vmatpush.bf16.msra.mxu2 %v2142_v48  ;;  %1001 = vmatpush.bf16.msra.mxu3 %v2139_v39 }
 0x117   :  { %915 = vmatpush.bf16.msra.mxu0 %v2145_v53  ;;  %949 = vmatpush.bf16.msra.mxu1 %v2149_v55 }
 0x118   :  { %984 = vmatpush.bf16.msra.mxu2 %v2157_v61  ;;  %1002 = vmatpush.bf16.msra.mxu3 %v2151_v56 }
 0x176   :  { %v663_v41 = vpop.f32.mrf.mxu0  ;;  %v697_v50 = vpop.f32.mrf.mxu1 }
 0x177   :  { %v667_v44 = vadd.f32 %v663_v41, %v2245_v12  ;;  %v701_v18 = vadd.f32 %v697_v50, %v2247_v14 }
 0x179   :  { %v1747_v4 = vmul.f32 -1.442695, %v667_v44  ;;  %v1748_v52 = vmul.f32 -1.442695, %v701_v18 }
 0x17b   :  { %1829 = vpow2.f32 %v1747_v4 }
 0x17c   :  { %1831 = vpow2.f32 %v1748_v52 }
 0x17d   :  { %v732_v13 = vpop.f32.mrf.mxu2  ;;  %v750_v51 = vpop.f32.mrf.mxu3 }
 0x17e   :  { %v754_v27 = vadd.f32 %v750_v51, %v2257_v29  ;;  %v665_v19 = vpop.f32.mrf.mxu0  ;;  %v699_v58 = vpop.f32.mrf.mxu1  ;;  %v736_v9 = vadd.f32 %v732_v13, %v2254_v25 }
 0x180   :  { %v1749_v62 = vmul.f32 -1.442695, %v754_v27 }
 0x181   :  { %v1830_v0 = vpop.eup %1829 }
 0x182   :  { %v1832_v1 = vpop.eup %1831  ;;  %v671_v63 = vadd.f32 1.0, %v1830_v0  ;;  %1833 = vpow2.f32 %v1749_v62 }
 0x183   :  { %v705_v40 = vadd.f32 1.0, %v1832_v1 }
 0x184   :  { %1835 = vrcp.f32 %v671_v63  ;;  %v683_v41 = vand.u32 2147483648, %v671_v63  ;;  %v681_v18 = vand.u32 2147483647, %v671_v63  ;;  %vm677_vm15 = vweird.f32 %v671_v63 }
 0x185   :  { %1837 = vrcp.f32 %v705_v40  ;;  %v734_v12 = vpop.f32.mrf.mxu2  ;;  %v752_v14 = vpop.f32.mrf.mxu3  ;;  %v717_v50 = vand.u32 2147483648, %v705_v40  ;;  %v715_v52 = vand.u32 2147483647, %v705_v40  ;;  %vm711_vm0 = vweird.f32 %v705_v40 }
 0x186   :  { %v684_v25 = vor.u32 1.1754944e-38, %v683_v41  ;;  %vm682_vm3 = vcmp.eq.f32.partialorder %v681_v18, 8.507059e+37 }
 0x187   :  { %v718_v58 = vor.u32 1.1754944e-38, %v717_v50  ;;  %vm716_vm4 = vcmp.eq.f32.partialorder %v715_v52, 8.507059e+37 }
 0x188   :  { %v1834_v36 = vpop.eup %1833 }
 0x189   :  { %v758_v10 = vadd.f32 1.0, %v1834_v36 }
 0x18a   :  { %v1836_v45 = vpop.eup %1835 }
 0x18b   :  { %v1838_v24 = vpop.eup %1837  ;;  %v673_v2 = vmul.f32 %v1836_v45, %v671_v63  ;;  %1839 = vrcp.f32 %v758_v10  ;;  %vm678_vm13 = vweird.f32 %v1836_v45  ;;  %vm764_vm6 = vweird.f32 %v758_v10 }
 0x18c   :  { %v707_v29 = vmul.f32 %v1838_v24, %v705_v40  ;;  %1841 = vtanh.f32 %v736_v9  ;;  %vm712_vm14 = vweird.f32 %v1838_v24  ;;  %vm679_vm1 = vmor %vm677_vm15, %vm678_vm13 }
 0x18d   :  { %v674_v26 = vsub.f32 1.0, %v673_v2  ;;  %vm713_vm2 = vmor %vm711_vm0, %vm712_vm14 }
 0x18e   :  { %v708_v5 = vsub.f32 1.0, %v707_v29 }
 0x18f   :  { %v675_v44 = vmul.f32 %v1836_v45, %v674_v26  ;;  %v770_v26 = vand.u32 2147483648, %v758_v10 }
 0x190   :  { %v709_v4 = vmul.f32 %v1838_v24, %v708_v5 }
 0x191   :  { %v1840_v51 = vpop.eup %1839  ;;  %v676_v27 = vadd.f32 %v1836_v45, %v675_v44  ;;  %v771_v41 = vor.u32 1.1754944e-38, %v770_v26 }
 0x192   :  { %v710_v13 = vadd.f32 %v1838_v24, %v709_v4  ;;  %v760_v19 = vmul.f32 %v1840_v51, %v758_v10  ;;  %v1842_v0 = vpop.eup %1841  ;;  %vm765_vm5 = vweird.f32 %v1840_v51 }
 0x193   :  { %v680_v62 = vsel %vm679_vm1, %v1836_v45, %v676_v27  ;;  %v768_v45 = vand.u32 2147483647, %v758_v10  ;;  %vm766_vm7 = vmor %vm764_vm6, %vm765_vm5 }
 0x194   :  { %v685_v1 = vsel %vm682_vm3, %v684_v25, %v680_v62  ;;  %v714_v12 = vsel %vm713_vm2, %v1838_v24, %v710_v13  ;;  %v761_v14 = vsub.f32 1.0, %v760_v19 }
 0x195   :  { %v719_v36 = vsel %vm716_vm4, %v718_v58, %v714_v12  ;;  %v738_v9 = vmul.f32 %v1842_v0, %v685_v1  ;;  %vm769_vm8 = vcmp.eq.f32.partialorder %v768_v45, 8.507059e+37 }
 0x196   :  { %v721_v2 = vmul.f32 %v719_v36, %v2323_v11  ;;  %v762_v29 = vmul.f32 %v1840_v51, %v761_v14 }
 0x198   :  { %v2363_v63 = vadd.f32 %v738_v9, %v721_v2  ;;  %v763_v40 = vadd.f32 %v1840_v51, %v762_v29 }
 0x19a   :  { %1843 = vtanh.f32 %v2363_v63  ;;  %v767_v5 = vsel %vm766_vm7, %v1840_v51, %v763_v40  ;;  %v2568_v40 = vld [vmem:[#allocation11_spill] sm:$0xff] }
 0x19b   :  { %v772_v50 = vsel %vm769_vm8, %v771_v41, %v767_v5 }
 0x1a0   :  { %v1844_v24 = vpop.eup %1843 }
 0x1a1   :  { %v775_v44 = vmul.f32 %v1844_v24, %v772_v50 }
 0x1a3   :  { %v776_v18 = vpack.c.bf16 %v775_v44, %v775_v44 }
 0x1a5   :  { %789 = vmatmul.bf16.vlgmr.msrb.gmra.mxu0 %v776_v18  ;;  %823 = vmatmul.bf16.vlgmr.msrb.gmra.mxu1 %v776_v18 }
 0x1a6   :  { %858 = vmatmul.bf16.vlgmr.msrb.gmra.mxu2 %v776_v18  ;;  %876 = vmatmul.bf16.vlgmr.msrb.gmra.mxu3 %v776_v18 }
 0x1a7   :  { %1035 = vmatpush.bf16.msrb.mxu0 %v2053_v16  ;;  %1069 = vmatpush.bf16.msrb.mxu1 %v2055_v20 }
 0x1a8   :  { %1104 = vmatpush.bf16.msrb.mxu2 %v2066_v31  ;;  %1122 = vmatpush.bf16.msrb.mxu3 %v2057_v21 }
 0x1ab   :  { %1036 = vmatpush.bf16.msrb.mxu0 %v2064_v30  ;;  %1070 = vmatpush.bf16.msrb.mxu1 %v2070_v34 }
 0x1ac   :  { %1105 = vmatpush.bf16.msrb.mxu2 %v2075_v42  ;;  %1123 = vmatpush.bf16.msrb.mxu3 %v2072_v35 }
 0x1af   :  { %1037 = vmatpush.bf16.msrb.mxu0 %v2078_v43  ;;  %1071 = vmatpush.bf16.msrb.mxu1 %v2082_v46 }
 0x1b0   :  { %1106 = vmatpush.bf16.msrb.mxu2 %v2087_v54  ;;  %1124 = vmatpush.bf16.msrb.mxu3 %v2084_v47 }
 0x1b3   :  { %1038 = vmatpush.bf16.msrb.mxu0 %v2093_v57  ;;  %1072 = vmatpush.bf16.msrb.mxu1 %v2097_v59 }
 0x1b4   :  { %1107 = vmatpush.bf16.msrb.mxu2 %v2102_v3  ;;  %1125 = vmatpush.bf16.msrb.mxu3 %v2099_v60 }
 0x1b7   :  { %1039 = vmatpush.bf16.msrb.mxu0 %v2105_v6  ;;  %1073 = vmatpush.bf16.msrb.mxu1 %v2109_v7 }
 0x1b8   :  { %1108 = vmatpush.bf16.msrb.mxu2 %v2115_v15  ;;  %1126 = vmatpush.bf16.msrb.mxu3 %v2111_v8 }
 0x1bb   :  { %1040 = vmatpush.bf16.msrb.mxu0 %v2121_v17  ;;  %1074 = vmatpush.bf16.msrb.mxu1 %v2125_v22 }
 0x1bc   :  { %1109 = vmatpush.bf16.msrb.mxu2 %v2130_v28  ;;  %1127 = vmatpush.bf16.msrb.mxu3 %v2127_v23 }
 0x1bf   :  { %1041 = vmatpush.bf16.msrb.mxu0 %v2133_v33  ;;  %1075 = vmatpush.bf16.msrb.mxu1 %v2137_v38 }
 0x1c0   :  { %1110 = vmatpush.bf16.msrb.mxu2 %v2142_v48  ;;  %1128 = vmatpush.bf16.msrb.mxu3 %v2139_v39 }
 0x1c3   :  { %1042 = vmatpush.bf16.msrb.mxu0 %v2145_v53  ;;  %1076 = vmatpush.bf16.msrb.mxu1 %v2149_v55 }
 0x1c4   :  { %1111 = vmatpush.bf16.msrb.mxu2 %v2157_v61  ;;  %1129 = vmatpush.bf16.msrb.mxu3 %v2151_v56 }
 0x222   :  { %v790_v11 = vpop.f32.mrf.mxu0  ;;  %v824_v10 = vpop.f32.mrf.mxu1 }
 0x223   :  { %v794_v4 = vadd.f32 %v790_v11, %v2259_v32  ;;  %v828_v52 = vadd.f32 %v824_v10, %v2261_v37 }
 0x225   :  { %v1750_v51 = vmul.f32 -1.442695, %v794_v4  ;;  %v1751_v27 = vmul.f32 -1.442695, %v828_v52 }
 0x227   :  { %1845 = vpow2.f32 %v1750_v51 }
 0x228   :  { %1847 = vpow2.f32 %v1751_v27 }
 0x229   :  { %v859_v25 = vpop.f32.mrf.mxu2  ;;  %v877_v13 = vpop.f32.mrf.mxu3 }
 0x22a   :  { %v881_v19 = vadd.f32 %v877_v13, %v2267_v49  ;;  %v792_v58 = vpop.f32.mrf.mxu0  ;;  %v826_v62 = vpop.f32.mrf.mxu1  ;;  %v863_v26 = vadd.f32 %v859_v25, %v2568_v40 }
 0x22c   :  { %v1752_v0 = vmul.f32 -1.442695, %v881_v19 }
 0x22d   :  { %v1846_v1 = vpop.eup %1845 }
 0x22e   :  { %v1848_v12 = vpop.eup %1847  ;;  %v798_v14 = vadd.f32 1.0, %v1846_v1  ;;  %1849 = vpow2.f32 %v1752_v0 }
 0x22f   :  { %v832_v36 = vadd.f32 1.0, %v1848_v12 }
 0x230   :  { %1851 = vrcp.f32 %v798_v14  ;;  %v810_v50 = vand.u32 2147483648, %v798_v14  ;;  %v808_v11 = vand.u32 2147483647, %v798_v14  ;;  %vm804_vm11 = vweird.f32 %v798_v14 }
 0x231   :  { %1853 = vrcp.f32 %v832_v36  ;;  %v861_v32 = vpop.f32.mrf.mxu2  ;;  %v879_v37 = vpop.f32.mrf.mxu3  ;;  %v844_v44 = vand.u32 2147483648, %v832_v36  ;;  %v842_v4 = vand.u32 2147483647, %v832_v36  ;;  %vm838_vm12 = vweird.f32 %v832_v36 }
 0x232   :  { %v811_v27 = vor.u32 1.1754944e-38, %v810_v50  ;;  %vm809_vm15 = vcmp.eq.f32.partialorder %v808_v11, 8.507059e+37  ;;  %v2570_v11 = vld [vmem:[#allocation13_spill] sm:$0xff] }
 0x233   :  { %v845_v19 = vor.u32 1.1754944e-38, %v844_v44  ;;  %vm843_vm0 = vcmp.eq.f32.partialorder %v842_v4, 8.507059e+37  ;;  %v2569_v44 = vld [vmem:[#allocation12_spill] sm:$0xff] }
 0x234   :  { %v1850_v9 = vpop.eup %1849 }
 0x235   :  { %v885_v2 = vadd.f32 1.0, %v1850_v9 }
 0x236   :  { %v1852_v29 = vpop.eup %1851 }
 0x237   :  { %v1854_v45 = vpop.eup %1853  ;;  %v800_v5 = vmul.f32 %v1852_v29, %v798_v14  ;;  %1855 = vrcp.f32 %v885_v2  ;;  %vm805_vm9 = vweird.f32 %v1852_v29  ;;  %vm891_vm2 = vweird.f32 %v885_v2 }
 0x238   :  { %v834_v49 = vmul.f32 %v1854_v45, %v832_v36  ;;  %1857 = vtanh.f32 %v863_v26  ;;  %vm839_vm10 = vweird.f32 %v1854_v45  ;;  %vm806_vm13 = vmor %vm804_vm11, %vm805_vm9  ;;  %v897_v26 = vand.u32 2147483648, %v885_v2 }
 0x239   :  { %v801_v41 = vsub.f32 1.0, %v800_v5  ;;  %vm840_vm14 = vmor %vm838_vm12, %vm839_vm10 }
 0x23a   :  { %v835_v24 = vsub.f32 1.0, %v834_v49  ;;  %v898_v49 = vor.u32 1.1754944e-38, %v897_v26 }
 0x23b   :  { %v802_v18 = vmul.f32 %v1852_v29, %v801_v41 }
 0x23c   :  { %v836_v10 = vmul.f32 %v1854_v45, %v835_v24 }
 0x23d   :  { %v1856_v52 = vpop.eup %1855  ;;  %v803_v51 = vadd.f32 %v1852_v29, %v802_v18 }
 0x23e   :  { %v837_v25 = vadd.f32 %v1854_v45, %v836_v10  ;;  %v887_v13 = vmul.f32 %v1856_v52, %v885_v2  ;;  %v1858_v62 = vpop.eup %1857  ;;  %vm892_vm1 = vweird.f32 %v1856_v52 }
 0x23f   :  { %v807_v58 = vsel %vm806_vm13, %v1852_v29, %v803_v51  ;;  %v895_v29 = vand.u32 2147483647, %v885_v2  ;;  %vm893_vm3 = vmor %vm891_vm2, %vm892_vm1 }
 0x240   :  { %v812_v0 = vsel %vm809_vm15, %v811_v27, %v807_v58  ;;  %v841_v1 = vsel %vm840_vm14, %v1854_v45, %v837_v25  ;;  %v888_v12 = vsub.f32 1.0, %v887_v13  ;;  %v2571_v25 = vld [vmem:[#allocation15_spill] sm:$0xff] }
 0x241   :  { %v846_v32 = vsel %vm843_vm0, %v845_v19, %v841_v1  ;;  %v865_v37 = vmul.f32 %v1858_v62, %v812_v0  ;;  %vm896_vm4 = vcmp.eq.f32.partialorder %v895_v29, 8.507059e+37  ;;  %v2572_v29 = vld [vmem:[#allocation14_spill] sm:$0xff] }
 0x242   :  { %v848_v9 = vmul.f32 %v846_v32, %v2363_v63  ;;  %v889_v40 = vmul.f32 %v1856_v52, %v888_v12 }
 0x244   :  { %v2403_v14 = vadd.f32 %v865_v37, %v848_v9  ;;  %v890_v36 = vadd.f32 %v1856_v52, %v889_v40 }
 0x246   :  { %1859 = vtanh.f32 %v2403_v14  ;;  %v894_v5 = vsel %vm893_vm3, %v1856_v52, %v890_v36 }
 0x247   :  { %v899_v41 = vsel %vm896_vm4, %v898_v49, %v894_v5 }
 0x24c   :  { %v1860_v45 = vpop.eup %1859 }
 0x24d   :  { %v902_v24 = vmul.f32 %v1860_v45, %v899_v41 }
 0x24f   :  { %v903_v50 = vpack.c.bf16 %v902_v24, %v902_v24 }
 0x251   :  { %916 = vmatmul.bf16.vlgmr.msra.gmra.mxu0 %v903_v50  ;;  %950 = vmatmul.bf16.vlgmr.msra.gmra.mxu1 %v903_v50 }
 0x252   :  { %985 = vmatmul.bf16.vlgmr.msra.gmra.mxu2 %v903_v50  ;;  %1003 = vmatmul.bf16.vlgmr.msra.gmra.mxu3 %v903_v50 }
 0x253   :  { %1162 = vmatpush.bf16.msra.mxu0 %v2053_v16  ;;  %1196 = vmatpush.bf16.msra.mxu1 %v2055_v20 }
 0x254   :  { %1231 = vmatpush.bf16.msra.mxu2 %v2066_v31  ;;  %1249 = vmatpush.bf16.msra.mxu3 %v2057_v21 }
 0x257   :  { %1163 = vmatpush.bf16.msra.mxu0 %v2064_v30  ;;  %1197 = vmatpush.bf16.msra.mxu1 %v2070_v34 }
 0x258   :  { %1232 = vmatpush.bf16.msra.mxu2 %v2075_v42  ;;  %1250 = vmatpush.bf16.msra.mxu3 %v2072_v35 }
 0x25b   :  { %1164 = vmatpush.bf16.msra.mxu0 %v2078_v43  ;;  %1198 = vmatpush.bf16.msra.mxu1 %v2082_v46 }
 0x25c   :  { %1233 = vmatpush.bf16.msra.mxu2 %v2087_v54  ;;  %1251 = vmatpush.bf16.msra.mxu3 %v2084_v47 }
 0x25f   :  { %1165 = vmatpush.bf16.msra.mxu0 %v2093_v57  ;;  %1199 = vmatpush.bf16.msra.mxu1 %v2097_v59 }
 0x260   :  { %1234 = vmatpush.bf16.msra.mxu2 %v2102_v3  ;;  %1252 = vmatpush.bf16.msra.mxu3 %v2099_v60 }
 0x263   :  { %1166 = vmatpush.bf16.msra.mxu0 %v2105_v6  ;;  %1200 = vmatpush.bf16.msra.mxu1 %v2109_v7 }
 0x264   :  { %1235 = vmatpush.bf16.msra.mxu2 %v2115_v15  ;;  %1253 = vmatpush.bf16.msra.mxu3 %v2111_v8 }
 0x267   :  { %1167 = vmatpush.bf16.msra.mxu0 %v2121_v17  ;;  %1201 = vmatpush.bf16.msra.mxu1 %v2125_v22 }
 0x268   :  { %1236 = vmatpush.bf16.msra.mxu2 %v2130_v28  ;;  %1254 = vmatpush.bf16.msra.mxu3 %v2127_v23 }
 0x26b   :  { %1168 = vmatpush.bf16.msra.mxu0 %v2133_v33  ;;  %1202 = vmatpush.bf16.msra.mxu1 %v2137_v38 }
 0x26c   :  { %1237 = vmatpush.bf16.msra.mxu2 %v2142_v48  ;;  %1255 = vmatpush.bf16.msra.mxu3 %v2139_v39 }
 0x26f   :  { %1169 = vmatpush.bf16.msra.mxu0 %v2145_v53  ;;  %1203 = vmatpush.bf16.msra.mxu1 %v2149_v55 }
 0x270   :  { %1238 = vmatpush.bf16.msra.mxu2 %v2157_v61  ;;  %1256 = vmatpush.bf16.msra.mxu3 %v2151_v56 }
 0x2ce   :  { %v917_v63 = vpop.f32.mrf.mxu0  ;;  %v951_v2 = vpop.f32.mrf.mxu1 }
 0x2cf   :  { %v921_v18 = vadd.f32 %v917_v63, %v2569_v44  ;;  %v955_v10 = vadd.f32 %v951_v2, %v2570_v11 }
 0x2d1   :  { %v1753_v4 = vmul.f32 -1.442695, %v921_v18  ;;  %v1754_v52 = vmul.f32 -1.442695, %v955_v10 }
 0x2d3   :  { %1861 = vpow2.f32 %v1753_v4 }
 0x2d4   :  { %1863 = vpow2.f32 %v1754_v52 }
 0x2d5   :  { %v986_v51 = vpop.f32.mrf.mxu2  ;;  %v1004_v27 = vpop.f32.mrf.mxu3 }
 0x2d6   :  { %v1008_v13 = vadd.f32 %v1004_v27, %v2571_v25  ;;  %v919_v19 = vpop.f32.mrf.mxu0  ;;  %v953_v58 = vpop.f32.mrf.mxu1  ;;  %v990_v5 = vadd.f32 %v986_v51, %v2572_v29 }
 0x2d8   :  { %v1755_v62 = vmul.f32 -1.442695, %v1008_v13 }
 0x2d9   :  { %v1862_v0 = vpop.eup %1861 }
 0x2da   :  { %v1864_v1 = vpop.eup %1863  ;;  %v925_v12 = vadd.f32 1.0, %v1862_v0  ;;  %1865 = vpow2.f32 %v1755_v62 }
 0x2db   :  { %v959_v32 = vadd.f32 1.0, %v1864_v1 }
 0x2dc   :  { %1867 = vrcp.f32 %v925_v12  ;;  %v937_v63 = vand.u32 2147483648, %v925_v12  ;;  %v935_v18 = vand.u32 2147483647, %v925_v12  ;;  %vm931_vm7 = vweird.f32 %v925_v12 }
 0x2dd   :  { %1869 = vrcp.f32 %v959_v32  ;;  %v988_v37 = vpop.f32.mrf.mxu2  ;;  %v1006_v9 = vpop.f32.mrf.mxu3  ;;  %v971_v2 = vand.u32 2147483648, %v959_v32  ;;  %v969_v10 = vand.u32 2147483647, %v959_v32  ;;  %vm965_vm8 = vweird.f32 %v959_v32 }
 0x2de   :  { %v938_v51 = vor.u32 1.1754944e-38, %v937_v63  ;;  %vm936_vm11 = vcmp.eq.f32.partialorder %v935_v18, 8.507059e+37  ;;  %v2574_v18 = vld [vmem:[#allocation17_spill] sm:$0xff] }
 0x2df   :  { %v972_v13 = vor.u32 1.1754944e-38, %v971_v2  ;;  %vm970_vm12 = vcmp.eq.f32.partialorder %v969_v10, 8.507059e+37  ;;  %v2573_v2 = vld [vmem:[#allocation16_spill] sm:$0xff] }
 0x2e0   :  { %v1866_v40 = vpop.eup %1865 }
 0x2e1   :  { %v1012_v36 = vadd.f32 1.0, %v1866_v40 }
 0x2e2   :  { %v1868_v26 = vpop.eup %1867 }
 0x2e3   :  { %v1870_v49 = vpop.eup %1869  ;;  %v927_v45 = vmul.f32 %v1868_v26, %v925_v12  ;;  %1871 = vrcp.f32 %v1012_v36  ;;  %vm932_vm5 = vweird.f32 %v1868_v26  ;;  %vm1018_vm14 = vweird.f32 %v1012_v36 }
 0x2e4   :  { %v961_v41 = vmul.f32 %v1870_v49, %v959_v32  ;;  %1873 = vtanh.f32 %v990_v5  ;;  %vm966_vm6 = vweird.f32 %v1870_v49  ;;  %vm933_vm9 = vmor %vm931_vm7, %vm932_vm5  ;;  %v1024_v5 = vand.u32 2147483648, %v1012_v36 }
 0x2e5   :  { %v928_v24 = vsub.f32 1.0, %v927_v45  ;;  %vm967_vm10 = vmor %vm965_vm8, %vm966_vm6 }
 0x2e6   :  { %v962_v50 = vsub.f32 1.0, %v961_v41  ;;  %v1025_v41 = vor.u32 1.1754944e-38, %v1024_v5 }
 0x2e7   :  { %v929_v44 = vmul.f32 %v1868_v26, %v928_v24 }
 0x2e8   :  { %v963_v11 = vmul.f32 %v1870_v49, %v962_v50 }
 0x2e9   :  { %v1872_v4 = vpop.eup %1871  ;;  %v930_v52 = vadd.f32 %v1868_v26, %v929_v44 }
 0x2ea   :  { %v964_v27 = vadd.f32 %v1870_v49, %v963_v11  ;;  %v1014_v25 = vmul.f32 %v1872_v4, %v1012_v36  ;;  %v1874_v58 = vpop.eup %1873  ;;  %vm1019_vm13 = vweird.f32 %v1872_v4 }
 0x2eb   :  { %v934_v19 = vsel %vm933_vm9, %v1868_v26, %v930_v52  ;;  %v1022_v26 = vand.u32 2147483647, %v1012_v36  ;;  %vm1020_vm15 = vmor %vm1018_vm14, %vm1019_vm13 }
 0x2ec   :  { %v939_v62 = vsel %vm936_vm11, %v938_v51, %v934_v19  ;;  %v968_v0 = vsel %vm967_vm10, %v1870_v49, %v964_v27  ;;  %v1015_v1 = vsub.f32 1.0, %v1014_v25  ;;  %v2575_v27 = vld [vmem:[#allocation19_spill] sm:$0xff] }
 0x2ed   :  { %v973_v37 = vsel %vm970_vm12, %v972_v13, %v968_v0  ;;  %v992_v9 = vmul.f32 %v1874_v58, %v939_v62  ;;  %vm1023_vm0 = vcmp.eq.f32.partialorder %v1022_v26, 8.507059e+37  ;;  %v2576_v26 = vld [vmem:[#allocation18_spill] sm:$0xff] }
 0x2ee   :  { %v975_v40 = vmul.f32 %v973_v37, %v2403_v14  ;;  %v1016_v29 = vmul.f32 %v1872_v4, %v1015_v1 }
 0x2f0   :  { %v2443_v12 = vadd.f32 %v992_v9, %v975_v40  ;;  %v1017_v32 = vadd.f32 %v1872_v4, %v1016_v29 }
 0x2f2   :  { %1875 = vtanh.f32 %v2443_v12  ;;  %v1021_v45 = vsel %vm1020_vm15, %v1872_v4, %v1017_v32 }
 0x2f3   :  { %v1026_v24 = vsel %vm1023_vm0, %v1025_v41, %v1021_v45 }
 0x2f8   :  { %v1876_v49 = vpop.eup %1875 }
 0x2f9   :  { %v1029_v50 = vmul.f32 %v1876_v49, %v1026_v24 }
 0x2fb   :  { %v1030_v63 = vpack.c.bf16 %v1029_v50, %v1029_v50 }
 0x2fd   :  { %1043 = vmatmul.bf16.vlgmr.msrb.gmra.mxu0 %v1030_v63  ;;  %1077 = vmatmul.bf16.vlgmr.msrb.gmra.mxu1 %v1030_v63 }
 0x2fe   :  { %1112 = vmatmul.bf16.vlgmr.msrb.gmra.mxu2 %v1030_v63  ;;  %1130 = vmatmul.bf16.vlgmr.msrb.gmra.mxu3 %v1030_v63 }
 0x2ff   :  { %1289 = vmatpush.bf16.msrb.mxu0 %v2053_v16  ;;  %1323 = vmatpush.bf16.msrb.mxu1 %v2055_v20 }
 0x300   :  { %1358 = vmatpush.bf16.msrb.mxu2 %v2066_v31  ;;  %1376 = vmatpush.bf16.msrb.mxu3 %v2057_v21 }
 0x303   :  { %1290 = vmatpush.bf16.msrb.mxu0 %v2064_v30  ;;  %1324 = vmatpush.bf16.msrb.mxu1 %v2070_v34 }
 0x304   :  { %1359 = vmatpush.bf16.msrb.mxu2 %v2075_v42  ;;  %1377 = vmatpush.bf16.msrb.mxu3 %v2072_v35 }
 0x307   :  { %1291 = vmatpush.bf16.msrb.mxu0 %v2078_v43  ;;  %1325 = vmatpush.bf16.msrb.mxu1 %v2082_v46 }
 0x308   :  { %1360 = vmatpush.bf16.msrb.mxu2 %v2087_v54  ;;  %1378 = vmatpush.bf16.msrb.mxu3 %v2084_v47 }
 0x30b   :  { %1292 = vmatpush.bf16.msrb.mxu0 %v2093_v57  ;;  %1326 = vmatpush.bf16.msrb.mxu1 %v2097_v59 }
 0x30c   :  { %1361 = vmatpush.bf16.msrb.mxu2 %v2102_v3  ;;  %1379 = vmatpush.bf16.msrb.mxu3 %v2099_v60 }
 0x30f   :  { %1293 = vmatpush.bf16.msrb.mxu0 %v2105_v6  ;;  %1327 = vmatpush.bf16.msrb.mxu1 %v2109_v7 }
 0x310   :  { %1362 = vmatpush.bf16.msrb.mxu2 %v2115_v15  ;;  %1380 = vmatpush.bf16.msrb.mxu3 %v2111_v8 }
 0x313   :  { %1294 = vmatpush.bf16.msrb.mxu0 %v2121_v17  ;;  %1328 = vmatpush.bf16.msrb.mxu1 %v2125_v22 }
 0x314   :  { %1363 = vmatpush.bf16.msrb.mxu2 %v2130_v28  ;;  %1381 = vmatpush.bf16.msrb.mxu3 %v2127_v23 }
 0x317   :  { %1295 = vmatpush.bf16.msrb.mxu0 %v2133_v33  ;;  %1329 = vmatpush.bf16.msrb.mxu1 %v2137_v38 }
 0x318   :  { %1364 = vmatpush.bf16.msrb.mxu2 %v2142_v48  ;;  %1382 = vmatpush.bf16.msrb.mxu3 %v2139_v39 }
 0x31b   :  { %1296 = vmatpush.bf16.msrb.mxu0 %v2145_v53  ;;  %1330 = vmatpush.bf16.msrb.mxu1 %v2149_v55 }
 0x31c   :  { %1365 = vmatpush.bf16.msrb.mxu2 %v2157_v61  ;;  %1383 = vmatpush.bf16.msrb.mxu3 %v2151_v56 }
 0x37a   :  { %v1044_v14 = vpop.f32.mrf.mxu0  ;;  %v1078_v36 = vpop.f32.mrf.mxu1 }
 0x37b   :  { %v1048_v44 = vadd.f32 %v1044_v14, %v2573_v2  ;;  %v1082_v11 = vadd.f32 %v1078_v36, %v2574_v18 }
 0x37d   :  { %v1756_v10 = vmul.f32 -1.442695, %v1048_v44  ;;  %v1757_v4 = vmul.f32 -1.442695, %v1082_v11 }
 0x37f   :  { %1877 = vpow2.f32 %v1756_v10 }
 0x380   :  { %1879 = vpow2.f32 %v1757_v4 }
 0x381   :  { %v1113_v52 = vpop.f32.mrf.mxu2  ;;  %v1131_v51 = vpop.f32.mrf.mxu3 }
 0x382   :  { %v1135_v25 = vadd.f32 %v1131_v51, %v2575_v27  ;;  %v1046_v13 = vpop.f32.mrf.mxu0  ;;  %v1080_v19 = vpop.f32.mrf.mxu1  ;;  %v1117_v45 = vadd.f32 %v1113_v52, %v2576_v26 }
 0x384   :  { %v1758_v58 = vmul.f32 -1.442695, %v1135_v25 }
 0x385   :  { %v1878_v62 = vpop.eup %1877 }
 0x386   :  { %v1880_v0 = vpop.eup %1879  ;;  %v1052_v1 = vadd.f32 1.0, %v1878_v62  ;;  %1881 = vpow2.f32 %v1758_v58 }
 0x387   :  { %v1086_v37 = vadd.f32 1.0, %v1880_v0 }
 0x388   :  { %1883 = vrcp.f32 %v1052_v1  ;;  %v1064_v14 = vand.u32 2147483648, %v1052_v1  ;;  %v1062_v44 = vand.u32 2147483647, %v1052_v1  ;;  %vm1058_vm3 = vweird.f32 %v1052_v1 }
 0x389   :  { %1885 = vrcp.f32 %v1086_v37  ;;  %v1115_v9 = vpop.f32.mrf.mxu2  ;;  %v1133_v40 = vpop.f32.mrf.mxu3  ;;  %v1098_v36 = vand.u32 2147483648, %v1086_v37  ;;  %v1096_v11 = vand.u32 2147483647, %v1086_v37  ;;  %vm1092_vm4 = vweird.f32 %v1086_v37 }
 0x38a   :  { %v1065_v52 = vor.u32 1.1754944e-38, %v1064_v14  ;;  %vm1063_vm7 = vcmp.eq.f32.partialorder %v1062_v44, 8.507059e+37 }
 0x38b   :  { %v1099_v25 = vor.u32 1.1754944e-38, %v1098_v36  ;;  %vm1097_vm8 = vcmp.eq.f32.partialorder %v1096_v11, 8.507059e+37 }
 0x38c   :  { %v1882_v29 = vpop.eup %1881 }
 0x38d   :  { %v1139_v32 = vadd.f32 1.0, %v1882_v29 }
 0x38e   :  { %v1884_v5 = vpop.eup %1883 }
 0x38f   :  { %v1886_v41 = vpop.eup %1885  ;;  %v1054_v49 = vmul.f32 %v1884_v5, %v1052_v1  ;;  %1887 = vrcp.f32 %v1139_v32  ;;  %vm1059_vm1 = vweird.f32 %v1884_v5  ;;  %vm1145_vm10 = vweird.f32 %v1139_v32 }
 0x390   :  { %v1088_v24 = vmul.f32 %v1886_v41, %v1086_v37  ;;  %1889 = vtanh.f32 %v1117_v45  ;;  %vm1093_vm2 = vweird.f32 %v1886_v41  ;;  %vm1060_vm5 = vmor %vm1058_vm3, %vm1059_vm1  ;;  %v1151_v45 = vand.u32 2147483648, %v1139_v32 }
 0x391   :  { %v1055_v50 = vsub.f32 1.0, %v1054_v49  ;;  %vm1094_vm6 = vmor %vm1092_vm4, %vm1093_vm2 }
 0x392   :  { %v1089_v63 = vsub.f32 1.0, %v1088_v24  ;;  %v1152_v24 = vor.u32 1.1754944e-38, %v1151_v45 }
 0x393   :  { %v1056_v2 = vmul.f32 %v1884_v5, %v1055_v50 }
 0x394   :  { %v1090_v18 = vmul.f32 %v1886_v41, %v1089_v63 }
 0x395   :  { %v1888_v10 = vpop.eup %1887  ;;  %v1057_v4 = vadd.f32 %v1884_v5, %v1056_v2 }
 0x396   :  { %v1091_v51 = vadd.f32 %v1886_v41, %v1090_v18  ;;  %v1141_v27 = vmul.f32 %v1888_v10, %v1139_v32  ;;  %v1890_v19 = vpop.eup %1889  ;;  %vm1146_vm9 = vweird.f32 %v1888_v10 }
 0x397   :  { %v1061_v13 = vsel %vm1060_vm5, %v1884_v5, %v1057_v4  ;;  %v1149_v5 = vand.u32 2147483647, %v1139_v32  ;;  %vm1147_vm11 = vmor %vm1145_vm10, %vm1146_vm9 }
 0x398   :  { %v1066_v58 = vsel %vm1063_vm7, %v1065_v52, %v1061_v13  ;;  %v1095_v62 = vsel %vm1094_vm6, %v1886_v41, %v1091_v51  ;;  %v1142_v0 = vsub.f32 1.0, %v1141_v27 }
 0x399   :  { %v1100_v9 = vsel %vm1097_vm8, %v1099_v25, %v1095_v62  ;;  %v1119_v40 = vmul.f32 %v1890_v19, %v1066_v58  ;;  %vm1150_vm12 = vcmp.eq.f32.partialorder %v1149_v5, 8.507059e+37 }
 0x39a   :  { %v1102_v29 = vmul.f32 %v1100_v9, %v2443_v12  ;;  %v1143_v26 = vmul.f32 %v1888_v10, %v1142_v0 }
 0x39c   :  { %v2483_v1 = vadd.f32 %v1119_v40, %v1102_v29  ;;  %v1144_v37 = vadd.f32 %v1888_v10, %v1143_v26 }
 0x39e   :  { %1891 = vtanh.f32 %v2483_v1  ;;  %v1148_v49 = vsel %vm1147_vm11, %v1888_v10, %v1144_v37 }
 0x39f   :  { %v1153_v50 = vsel %vm1150_vm12, %v1152_v24, %v1148_v49 }
 0x3a4   :  { %v1892_v41 = vpop.eup %1891 }
 0x3a5   :  { %v1156_v63 = vmul.f32 %v1892_v41, %v1153_v50 }
 0x3a7   :  { %v1157_v14 = vpack.c.bf16 %v1156_v63, %v1156_v63 }
 0x3a9   :  { %1170 = vmatmul.bf16.vlgmr.msra.gmra.mxu0 %v1157_v14  ;;  %1204 = vmatmul.bf16.vlgmr.msra.gmra.mxu1 %v1157_v14 }
 0x3aa   :  { %1239 = vmatmul.bf16.vlgmr.msra.gmra.mxu2 %v1157_v14  ;;  %1257 = vmatmul.bf16.vlgmr.msra.gmra.mxu3 %v1157_v14 }
 0x3ab   :  { %1416 = vmatpush.bf16.msra.mxu0 %v2053_v16  ;;  %1450 = vmatpush.bf16.msra.mxu1 %v2055_v20 }
 0x3ac   :  { %1485 = vmatpush.bf16.msra.mxu2 %v2066_v31  ;;  %1503 = vmatpush.bf16.msra.mxu3 %v2057_v21  ;;  %v2577_v21 = vld [vmem:[#allocation20_spill] sm:$0xff]  ;;  %v2578_v31 = vld [vmem:[#allocation21_spill] sm:$0xff] }
 0x3af   :  { %1417 = vmatpush.bf16.msra.mxu0 %v2064_v30  ;;  %1451 = vmatpush.bf16.msra.mxu1 %v2070_v34 }
 0x3b0   :  { %1486 = vmatpush.bf16.msra.mxu2 %v2075_v42  ;;  %1504 = vmatpush.bf16.msra.mxu3 %v2072_v35 }
 0x3b3   :  { %1418 = vmatpush.bf16.msra.mxu0 %v2078_v43  ;;  %1452 = vmatpush.bf16.msra.mxu1 %v2082_v46 }
 0x3b4   :  { %1487 = vmatpush.bf16.msra.mxu2 %v2087_v54  ;;  %1505 = vmatpush.bf16.msra.mxu3 %v2084_v47  ;;  %v2579_v47 = vld [vmem:[#allocation23_spill] sm:$0xff] }
 0x3b7   :  { %1419 = vmatpush.bf16.msra.mxu0 %v2093_v57  ;;  %1453 = vmatpush.bf16.msra.mxu1 %v2097_v59 }
 0x3b8   :  { %1488 = vmatpush.bf16.msra.mxu2 %v2102_v3  ;;  %1506 = vmatpush.bf16.msra.mxu3 %v2099_v60 }
 0x3bb   :  { %1420 = vmatpush.bf16.msra.mxu0 %v2105_v6  ;;  %1454 = vmatpush.bf16.msra.mxu1 %v2109_v7 }
 0x3bc   :  { %1489 = vmatpush.bf16.msra.mxu2 %v2115_v15  ;;  %1507 = vmatpush.bf16.msra.mxu3 %v2111_v8 }
 0x3bf   :  { %1421 = vmatpush.bf16.msra.mxu0 %v2121_v17  ;;  %1455 = vmatpush.bf16.msra.mxu1 %v2125_v22 }
 0x3c0   :  { %1490 = vmatpush.bf16.msra.mxu2 %v2130_v28  ;;  %1508 = vmatpush.bf16.msra.mxu3 %v2127_v23 }
 0x3c3   :  { %1422 = vmatpush.bf16.msra.mxu0 %v2133_v33  ;;  %1456 = vmatpush.bf16.msra.mxu1 %v2137_v38  ;;  %v2580_v33 = vld [vmem:[#allocation22_spill] sm:$0xff] }
 0x3c4   :  { %1491 = vmatpush.bf16.msra.mxu2 %v2142_v48  ;;  %1509 = vmatpush.bf16.msra.mxu3 %v2139_v39 }
 0x3c7   :  { %1423 = vmatpush.bf16.msra.mxu0 %v2145_v53  ;;  %1457 = vmatpush.bf16.msra.mxu1 %v2149_v55 }
 0x3c8   :  { %1492 = vmatpush.bf16.msra.mxu2 %v2157_v61  ;;  %1510 = vmatpush.bf16.msra.mxu3 %v2151_v56 }
 0x426   :  { %v1171_v16 = vpop.f32.mrf.mxu0  ;;  %v1205_v20 = vpop.f32.mrf.mxu1 }
 0x427   :  { %v1175_v30 = vadd.f32 %v1171_v16, %v2577_v21  ;;  %v1209_v34 = vadd.f32 %v1205_v20, %v2578_v31  ;;  %v2581_v16 = vld [vmem:[#allocation24_spill] sm:$0xff]  ;;  %v2582_v21 = vld [vmem:[#allocation25_spill] sm:$0xff] }
 0x429   :  { %v1759_v35 = vmul.f32 -1.442695, %v1175_v30  ;;  %v1760_v42 = vmul.f32 -1.442695, %v1209_v34 }
 0x42b   :  { %1893 = vpow2.f32 %v1759_v35 }
 0x42c   :  { %1895 = vpow2.f32 %v1760_v42 }
 0x42d   :  { %v1240_v43 = vpop.f32.mrf.mxu2  ;;  %v1258_v46 = vpop.f32.mrf.mxu3 }
 0x42e   :  { %v1262_v54 = vadd.f32 %v1258_v46, %v2579_v47  ;;  %v1173_v57 = vpop.f32.mrf.mxu0  ;;  %v1207_v59 = vpop.f32.mrf.mxu1  ;;  %v1244_v38 = vadd.f32 %v1240_v43, %v2580_v33  ;;  %v2583_v43 = vld [vmem:[#allocation27_spill] sm:$0xff] }
 0x430   :  { %v1761_v60 = vmul.f32 -1.442695, %v1262_v54 }
 0x431   :  { %v1894_v3 = vpop.eup %1893 }
 0x432   :  { %v1896_v6 = vpop.eup %1895  ;;  %v1179_v7 = vadd.f32 1.0, %v1894_v3  ;;  %1897 = vpow2.f32 %v1761_v60 }
 0x433   :  { %v1213_v8 = vadd.f32 1.0, %v1896_v6 }
 0x434   :  { %1899 = vrcp.f32 %v1179_v7  ;;  %v1191_v61 = vand.u32 2147483648, %v1179_v7  ;;  %v1189_v36 = vand.u32 2147483647, %v1179_v7  ;;  %vm1185_vm15 = vweird.f32 %v1179_v7 }
 0x435   :  { %1901 = vrcp.f32 %v1213_v8  ;;  %v1242_v15 = vpop.f32.mrf.mxu2  ;;  %v1260_v17 = vpop.f32.mrf.mxu3  ;;  %v1225_v12 = vand.u32 2147483648, %v1213_v8  ;;  %v1223_v44 = vand.u32 2147483647, %v1213_v8  ;;  %vm1219_vm0 = vweird.f32 %v1213_v8 }
 0x436   :  { %v1192_v10 = vor.u32 1.1754944e-38, %v1191_v61  ;;  %vm1190_vm3 = vcmp.eq.f32.partialorder %v1189_v36, 8.507059e+37 }
 0x437   :  { %v1226_v51 = vor.u32 1.1754944e-38, %v1225_v12  ;;  %vm1224_vm4 = vcmp.eq.f32.partialorder %v1223_v44, 8.507059e+37 }
 0x438   :  { %v1898_v22 = vpop.eup %1897 }
 0x439   :  { %v1266_v23 = vadd.f32 1.0, %v1898_v22 }
 0x43a   :  { %v1900_v28 = vpop.eup %1899 }
 0x43b   :  { %v1902_v39 = vpop.eup %1901  ;;  %v1181_v48 = vmul.f32 %v1900_v28, %v1179_v7  ;;  %1903 = vrcp.f32 %v1266_v23  ;;  %vm1186_vm13 = vweird.f32 %v1900_v28  ;;  %v1278_v37 = vand.u32 2147483648, %v1266_v23 }
 0x43c   :  { %v1215_v53 = vmul.f32 %v1902_v39, %v1213_v8  ;;  %1905 = vtanh.f32 %v1244_v38  ;;  %vm1220_vm14 = vweird.f32 %v1902_v39  ;;  %vm1187_vm1 = vmor %vm1185_vm15, %vm1186_vm13  ;;  %vm1272_vm6 = vweird.f32 %v1266_v23 }
 0x43d   :  { %v1182_v55 = vsub.f32 1.0, %v1181_v48  ;;  %vm1221_vm2 = vmor %vm1219_vm0, %vm1220_vm14  ;;  %v1276_v45 = vand.u32 2147483647, %v1266_v23  ;;  %v1279_v49 = vor.u32 1.1754944e-38, %v1278_v37 }
 0x43e   :  { %v1216_v56 = vsub.f32 1.0, %v1215_v53 }
 0x43f   :  { %v1183_v32 = vmul.f32 %v1900_v28, %v1182_v55  ;;  %vm1277_vm8 = vcmp.eq.f32.partialorder %v1276_v45, 8.507059e+37 }
 0x440   :  { %v1217_v2 = vmul.f32 %v1902_v39, %v1216_v56 }
 0x441   :  { %v1904_v18 = vpop.eup %1903  ;;  %v1184_v11 = vadd.f32 %v1900_v28, %v1183_v32 }
 0x442   :  { %v1218_v4 = vadd.f32 %v1902_v39, %v1217_v2  ;;  %v1268_v52 = vmul.f32 %v1904_v18, %v1266_v23  ;;  %v1906_v25 = vpop.eup %1905  ;;  %vm1273_vm5 = vweird.f32 %v1904_v18  ;;  %v2584_v23 = vld [vmem:[#allocation26_spill] sm:$0xff] }
 0x443   :  { %v1188_v27 = vsel %vm1187_vm1, %v1900_v28, %v1184_v11  ;;  %vm1274_vm7 = vmor %vm1272_vm6, %vm1273_vm5 }
 0x444   :  { %v1193_v13 = vsel %vm1190_vm3, %v1192_v10, %v1188_v27  ;;  %v1222_v19 = vsel %vm1221_vm2, %v1902_v39, %v1218_v4  ;;  %v1269_v58 = vsub.f32 1.0, %v1268_v52 }
 0x445   :  { %v1227_v62 = vsel %vm1224_vm4, %v1226_v51, %v1222_v19  ;;  %v1246_v0 = vmul.f32 %v1906_v25, %v1193_v13 }
 0x446   :  { %v1229_v9 = vmul.f32 %v1227_v62, %v2483_v1  ;;  %v1270_v40 = vmul.f32 %v1904_v18, %v1269_v58 }
 0x448   :  { %v2523_v29 = vadd.f32 %v1246_v0, %v1229_v9  ;;  %v1271_v26 = vadd.f32 %v1904_v18, %v1270_v40 }
 0x44a   :  { %1907 = vtanh.f32 %v2523_v29  ;;  %v1275_v5 = vsel %vm1274_vm7, %v1904_v18, %v1271_v26 }
 0x44b   :  { %v1280_v41 = vsel %vm1277_vm8, %v1279_v49, %v1275_v5 }
 0x450   :  { %v1908_v24 = vpop.eup %1907 }
 0x451   :  { %v1283_v50 = vmul.f32 %v1908_v24, %v1280_v41 }
 0x453   :  { %v1284_v63 = vpack.c.bf16 %v1283_v50, %v1283_v50 }
 0x455   :  { %1297 = vmatmul.bf16.vlgmr.msrb.gmra.mxu0 %v1284_v63  ;;  %1331 = vmatmul.bf16.vlgmr.msrb.gmra.mxu1 %v1284_v63 }
 0x456   :  { %1366 = vmatmul.bf16.vlgmr.msrb.gmra.mxu2 %v1284_v63  ;;  %1384 = vmatmul.bf16.vlgmr.msrb.gmra.mxu3 %v1284_v63 }
 0x4d2   :  { %v1298_v1 = vpop.f32.mrf.mxu0  ;;  %v1332_v14 = vpop.f32.mrf.mxu1 }
 0x4d3   :  { %v1302_v20 = vadd.f32 %v1298_v1, %v2581_v16  ;;  %v1336_v30 = vadd.f32 %v1332_v14, %v2582_v21  ;;  %v2585_v1 = vld [vmem:[#allocation28_spill] sm:$0xff]  ;;  %v2586_v16 = vld [vmem:[#allocation29_spill] sm:$0xff] }
 0x4d5   :  { %v1762_v31 = vmul.f32 -1.442695, %v1302_v20  ;;  %v1763_v34 = vmul.f32 -1.442695, %v1336_v30 }
 0x4d7   :  { %1909 = vpow2.f32 %v1762_v31 }
 0x4d8   :  { %1911 = vpow2.f32 %v1763_v34 }
 0x4d9   :  { %v1367_v35 = vpop.f32.mrf.mxu2  ;;  %v1385_v42 = vpop.f32.mrf.mxu3 }
 0x4da   :  { %v1389_v46 = vadd.f32 %v1385_v42, %v2583_v43  ;;  %v1300_v47 = vpop.f32.mrf.mxu0  ;;  %v1334_v54 = vpop.f32.mrf.mxu1  ;;  %v1371_v28 = vadd.f32 %v1367_v35, %v2584_v23  ;;  %v2587_v35 = vld [vmem:[#allocation31_spill] sm:$0xff] }
 0x4dc   :  { %v1764_v57 = vmul.f32 -1.442695, %v1389_v46 }
 0x4dd   :  { %v1910_v59 = vpop.eup %1909 }
 0x4de   :  { %v1912_v60 = vpop.eup %1911  ;;  %v1306_v3 = vadd.f32 1.0, %v1910_v59  ;;  %1913 = vpow2.f32 %v1764_v57 }
 0x4df   :  { %v1340_v6 = vadd.f32 1.0, %v1912_v60 }
 0x4e0   :  { %1915 = vrcp.f32 %v1306_v3  ;;  %v1318_v55 = vand.u32 2147483648, %v1306_v3  ;;  %v1316_v12 = vand.u32 2147483647, %v1306_v3  ;;  %vm1312_vm11 = vweird.f32 %v1306_v3 }
 0x4e1   :  { %1917 = vrcp.f32 %v1340_v6  ;;  %v1369_v7 = vpop.f32.mrf.mxu2  ;;  %v1387_v8 = vpop.f32.mrf.mxu3  ;;  %v1352_v56 = vand.u32 2147483648, %v1340_v6  ;;  %v1350_v36 = vand.u32 2147483647, %v1340_v6  ;;  %vm1346_vm12 = vweird.f32 %v1340_v6 }
 0x4e2   :  { %v1319_v18 = vor.u32 1.1754944e-38, %v1318_v55  ;;  %vm1317_vm15 = vcmp.eq.f32.partialorder %v1316_v12, 8.507059e+37 }
 0x4e3   :  { %v1353_v4 = vor.u32 1.1754944e-38, %v1352_v56  ;;  %vm1351_vm0 = vcmp.eq.f32.partialorder %v1350_v36, 8.507059e+37 }
 0x4e4   :  { %v1914_v15 = vpop.eup %1913 }
 0x4e5   :  { %v1393_v17 = vadd.f32 1.0, %v1914_v15 }
 0x4e6   :  { %v1916_v22 = vpop.eup %1915 }
 0x4e7   :  { %v1918_v33 = vpop.eup %1917  ;;  %v1308_v38 = vmul.f32 %v1916_v22, %v1306_v3  ;;  %1919 = vrcp.f32 %v1393_v17  ;;  %vm1313_vm9 = vweird.f32 %v1916_v22  ;;  %v1405_v26 = vand.u32 2147483648, %v1393_v17 }
 0x4e8   :  { %v1342_v39 = vmul.f32 %v1918_v33, %v1340_v6  ;;  %1921 = vtanh.f32 %v1371_v28  ;;  %vm1347_vm10 = vweird.f32 %v1918_v33  ;;  %vm1314_vm13 = vmor %vm1312_vm11, %vm1313_vm9  ;;  %vm1399_vm2 = vweird.f32 %v1393_v17 }
 0x4e9   :  { %v1309_v48 = vsub.f32 1.0, %v1308_v38  ;;  %vm1348_vm14 = vmor %vm1346_vm12, %vm1347_vm10  ;;  %v1403_v37 = vand.u32 2147483647, %v1393_v17  ;;  %v1406_v5 = vor.u32 1.1754944e-38, %v1405_v26 }
 0x4ea   :  { %v1343_v53 = vsub.f32 1.0, %v1342_v39 }
 0x4eb   :  { %v1310_v61 = vmul.f32 %v1916_v22, %v1309_v48  ;;  %vm1404_vm4 = vcmp.eq.f32.partialorder %v1403_v37, 8.507059e+37 }
 0x4ec   :  { %v1344_v32 = vmul.f32 %v1918_v33, %v1343_v53 }
 0x4ed   :  { %v1920_v2 = vpop.eup %1919  ;;  %v1311_v44 = vadd.f32 %v1916_v22, %v1310_v61 }
 0x4ee   :  { %v1345_v11 = vadd.f32 %v1918_v33, %v1344_v32  ;;  %v1395_v10 = vmul.f32 %v1920_v2, %v1393_v17  ;;  %v1922_v51 = vpop.eup %1921  ;;  %vm1400_vm1 = vweird.f32 %v1920_v2  ;;  %v2588_v17 = vld [vmem:[#allocation30_spill] sm:$0xff] }
 0x4ef   :  { %v1315_v52 = vsel %vm1314_vm13, %v1916_v22, %v1311_v44  ;;  %vm1401_vm3 = vmor %vm1399_vm2, %vm1400_vm1 }
 0x4f0   :  { %v1320_v27 = vsel %vm1317_vm15, %v1319_v18, %v1315_v52  ;;  %v1349_v25 = vsel %vm1348_vm14, %v1918_v33, %v1345_v11  ;;  %v1396_v13 = vsub.f32 1.0, %v1395_v10 }
 0x4f1   :  { %v1354_v19 = vsel %vm1351_vm0, %v1353_v4, %v1349_v25  ;;  %v1373_v58 = vmul.f32 %v1922_v51, %v1320_v27 }
 0x4f2   :  { %v1356_v62 = vmul.f32 %v1354_v19, %v2523_v29  ;;  %v1397_v0 = vmul.f32 %v1920_v2, %v1396_v13 }
 0x4f4   :  { %v2531_v9 = vadd.f32 %v1373_v58, %v1356_v62  ;;  %v1398_v40 = vadd.f32 %v1920_v2, %v1397_v0 }
 0x4f6   :  { %1923 = vtanh.f32 %v2531_v9  ;;  %v1402_v45 = vsel %vm1401_vm3, %v1920_v2, %v1398_v40 }
 0x4f7   :  { %v1407_v24 = vsel %vm1404_vm4, %v1406_v5, %v1402_v45 }
 0x4fc   :  { %v1924_v49 = vpop.eup %1923 }
 0x4fd   :  { %v1410_v41 = vmul.f32 %v1924_v49, %v1407_v24 }
 0x4ff   :  { %v1411_v50 = vpack.c.bf16 %v1410_v41, %v1410_v41 }
 0x501   :  { %1424 = vmatmul.bf16.vlgmr.msra.gmra.mxu0 %v1411_v50  ;;  %1458 = vmatmul.bf16.vlgmr.msra.gmra.mxu1 %v1411_v50 }
 0x502   :  { %1493 = vmatmul.bf16.vlgmr.msra.gmra.mxu2 %v1411_v50  ;;  %1511 = vmatmul.bf16.vlgmr.msra.gmra.mxu3 %v1411_v50 }
 0x57e   :  { %v1425_v29 = vpop.f32.mrf.mxu0  ;;  %v1459_v63 = vpop.f32.mrf.mxu1 }
 0x57f   :  { %v1429_v14 = vadd.f32 %v1425_v29, %v2585_v1  ;;  %v1463_v20 = vadd.f32 %v1459_v63, %v2586_v16 }
 0x581   :  { %v1765_v21 = vmul.f32 -1.442695, %v1429_v14  ;;  %v1766_v30 = vmul.f32 -1.442695, %v1463_v20 }
 0x583   :  { %1925 = vpow2.f32 %v1765_v21 }
 0x584   :  { %1927 = vpow2.f32 %v1766_v30 }
 0x585   :  { %v1494_v31 = vpop.f32.mrf.mxu2  ;;  %v1512_v34 = vpop.f32.mrf.mxu3 }
 0x586   :  { %v1516_v42 = vadd.f32 %v1512_v34, %v2587_v35  ;;  %v1427_v43 = vpop.f32.mrf.mxu0  ;;  %v1461_v46 = vpop.f32.mrf.mxu1  ;;  %v1498_v22 = vadd.f32 %v1494_v31, %v2588_v17 }
 0x588   :  { %v1767_v47 = vmul.f32 -1.442695, %v1516_v42 }
 0x589   :  { %v1926_v54 = vpop.eup %1925 }
 0x58a   :  { %v1928_v57 = vpop.eup %1927  ;;  %v1433_v59 = vadd.f32 1.0, %v1926_v54  ;;  %1929 = vpow2.f32 %v1767_v47 }
 0x58b   :  { %v1467_v60 = vadd.f32 1.0, %v1928_v57 }
 0x58c   :  { %1931 = vrcp.f32 %v1433_v59  ;;  %v1445_v48 = vand.u32 2147483648, %v1433_v59  ;;  %v1443_v56 = vand.u32 2147483647, %v1433_v59  ;;  %vm1439_vm7 = vweird.f32 %v1433_v59 }
 0x58d   :  { %1933 = vrcp.f32 %v1467_v60  ;;  %v1496_v3 = vpop.f32.mrf.mxu2  ;;  %v1514_v6 = vpop.f32.mrf.mxu3  ;;  %v1479_v53 = vand.u32 2147483648, %v1467_v60  ;;  %v1477_v12 = vand.u32 2147483647, %v1467_v60  ;;  %vm1473_vm8 = vweird.f32 %v1467_v60 }
 0x58e   :  { %v1446_v2 = vor.u32 1.1754944e-38, %v1445_v48  ;;  %vm1444_vm11 = vcmp.eq.f32.partialorder %v1443_v56, 8.507059e+37 }
 0x58f   :  { %v1480_v11 = vor.u32 1.1754944e-38, %v1479_v53  ;;  %vm1478_vm12 = vcmp.eq.f32.partialorder %v1477_v12, 8.507059e+37 }
 0x590   :  { %v1930_v7 = vpop.eup %1929 }
 0x591   :  { %v1520_v8 = vadd.f32 1.0, %v1930_v7 }
 0x592   :  { %v1932_v15 = vpop.eup %1931 }
 0x593   :  { %v1934_v23 = vpop.eup %1933  ;;  %v1435_v28 = vmul.f32 %v1932_v15, %v1433_v59  ;;  %1935 = vrcp.f32 %v1520_v8  ;;  %vm1440_vm5 = vweird.f32 %v1932_v15  ;;  %v1532_v40 = vand.u32 2147483648, %v1520_v8 }
 0x594   :  { %v1469_v33 = vmul.f32 %v1934_v23, %v1467_v60  ;;  %1937 = vtanh.f32 %v1498_v22  ;;  %vm1474_vm6 = vweird.f32 %v1934_v23  ;;  %vm1441_vm9 = vmor %vm1439_vm7, %vm1440_vm5  ;;  %vm1526_vm14 = vweird.f32 %v1520_v8 }
 0x595   :  { %v1436_v38 = vsub.f32 1.0, %v1435_v28  ;;  %vm1475_vm10 = vmor %vm1473_vm8, %vm1474_vm6  ;;  %v1530_v26 = vand.u32 2147483647, %v1520_v8  ;;  %v1533_v45 = vor.u32 1.1754944e-38, %v1532_v40 }
 0x596   :  { %v1470_v39 = vsub.f32 1.0, %v1469_v33 }
 0x597   :  { %v1437_v55 = vmul.f32 %v1932_v15, %v1436_v38  ;;  %vm1531_vm0 = vcmp.eq.f32.partialorder %v1530_v26, 8.507059e+37 }
 0x598   :  { %v1471_v61 = vmul.f32 %v1934_v23, %v1470_v39 }
 0x599   :  { %v1936_v32 = vpop.eup %1935  ;;  %v1438_v36 = vadd.f32 %v1932_v15, %v1437_v55 }
 0x59a   :  { %v1472_v44 = vadd.f32 %v1934_v23, %v1471_v61  ;;  %v1522_v18 = vmul.f32 %v1936_v32, %v1520_v8  ;;  %v1938_v4 = vpop.eup %1937  ;;  %vm1527_vm13 = vweird.f32 %v1936_v32 }
 0x59b   :  { %v1442_v10 = vsel %vm1441_vm9, %v1932_v15, %v1438_v36  ;;  %vm1528_vm15 = vmor %vm1526_vm14, %vm1527_vm13 }
 0x59c   :  { %v1447_v52 = vsel %vm1444_vm11, %v1446_v2, %v1442_v10  ;;  %v1476_v51 = vsel %vm1475_vm10, %v1934_v23, %v1472_v44  ;;  %v1523_v27 = vsub.f32 1.0, %v1522_v18 }
 0x59d   :  { %v1481_v25 = vsel %vm1478_vm12, %v1480_v11, %v1476_v51  ;;  %v1500_v13 = vmul.f32 %v1938_v4, %v1447_v52 }
 0x59e   :  { %v1483_v19 = vmul.f32 %v1481_v25, %v2531_v9  ;;  %v1524_v58 = vmul.f32 %v1936_v32, %v1523_v27 }
 0x5a0   :  { %v1501_v62 = vadd.f32 %v1500_v13, %v1483_v19  ;;  %v1525_v0 = vadd.f32 %v1936_v32, %v1524_v58 }
 0x5a2   :  { %1939 = vtanh.f32 %v1501_v62  ;;  %v1529_v37 = vsel %vm1528_vm15, %v1936_v32, %v1525_v0 }
 0x5a3   :  { %v1534_v9 = vsel %vm1531_vm0, %v1533_v45, %v1529_v37 }
 0x5a8   :  { %v1940_v5 = vpop.eup %1939 }
 0x5a9   :  { %v1537_v49 = vmul.f32 %v1940_v5, %v1534_v9 }
 0x5ab   :  { %1543 = vst [vmem:[#allocation8] sm:$0xff] %v1537_v49 }
 0x5ac   :  { %1554 = dma.vmem_to_hbm [thread:$0]  %s1550_s19, 128, %s1552_s22, [#allocation7]  }
 0x5ad   :  { %1991 = dma.done.wait [#allocation7], 128  }
 0x5ae   :  { %1992 = vsyncadd [#allocation7], 4294967168 }
 0x5af   :  { %1559 = vsyncpa [#allocation6], 1 }
 0x5b0   :  { %1560 = vsyncpa [#allocation7], 1 }

</bundles_post_ra>
